<compile_context>
chip_gen: v7x
topology: tpu7x:2x2x1
jax: 0.10.0
libtpu: 0.0.40
codegen_flags: <defaults>
</compile_context>

<pallas_src>
import jax
import jax.numpy as jnp
from jax.experimental import pallas as pl
from jax.experimental.pallas import tpu as pltpu

DIM = 32            # entity/relation embedding dim (module default 100)
ATTN_DIM = 16       # attention hidden dim (module default 32)
EPS = 0.01
LEAKY_SLOPE = 0.2
EMB_DTYPE = jnp.bfloat16   # HBM storage dtype for the embedding tables
# self.norm = 1 -> L1 distance between L2-normalized h + r - t


def _round_up(x, m):
    return ((x + m - 1) // m) * m


# ------------------------------- kernel --------------------------------------

def fused_kernel(lens_ref,
                 s_h_ref, p_h_ref, c_h_ref,
                 s_t_ref, p_t_ref, c_t_ref,
                 r_ref,
                 vps_ref, vpn_ref, vcs_ref, vcn_ref,
                 wgs_ref, wgp_ref, wgc_ref, bg_ref,
                 out_ref):
    """Head & tail taxonomy aggregation + TransE distance for one batch tile."""
    vps = vps_ref[...]
    vpn = vpn_ref[...]
    vcs = vcs_ref[...]
    vcn = vcn_ref[...]
    wgs = wgs_ref[...]
    wgp = wgp_ref[...]
    wgc = wgc_ref[...]
    bg = bg_ref[...]

    lens = lens_ref[...]                                   # (TB, 4) int32
    tb = lens.shape[0]

    def neigh_mask(col, max_len):
        it = jax.lax.broadcasted_iota(jnp.int32, (tb, max_len), 1)
        return it < lens[:, col:col + 1]                   # (TB, L) bool

    def attend(emb_s, emb_n, mask, v_s, v_n):
        # Folded scorer (exact: LeakyReLU is applied AFTER both bias-free
        # Linears in the reference module):
        #   cat([h_s, emb_n]) @ W1^T @ W2^T == emb_s.v_s + emb_n.v_n
        s_score = jnp.sum(emb_s * v_s, axis=-1, keepdims=True)       # (TB, 1)
        n_score = jnp.sum(emb_n * v_n[None], axis=-1)                # (TB, L)
        scores = n_score + s_score
        scores = jnp.where(scores >= 0, scores, LEAKY_SLOPE * scores)  # LeakyReLU
        # masked softmax over neighbors; masked logits sit at -1e30 so their
        # exp underflows to exactly 0 (every row has >= 1 valid neighbor).
        logits = jnp.where(mask, scores, jnp.float32(-1e30))
        m = jnp.max(logits, axis=-1, keepdims=True)
        e = jnp.exp(logits - m)
        denom = jnp.sum(e, axis=-1, keepdims=True)
        attn = e * pl.reciprocal(denom, approx=True)
        return jnp.sum(attn[:, :, None] * emb_n, axis=1)             # (TB, D)

    def aggregate(emb_s, emb_p, emb_c, mask_p, mask_c):
        p_agg = attend(emb_s, emb_p, mask_p, vps, vpn)
        c_agg = attend(emb_s, emb_c, mask_c, vcs, vcn)
        # TODO(synk): nn.Dropout(p=0.3) omitted (eval-mode identity).
        # emb_generator Linear(3D->D)+ReLU on cat([(1+eps)*s, p, c]); the
        # (1+eps) self-scale is folded into wgs offline.
        out = (jnp.dot(emb_s, wgs, preferred_element_type=jnp.float32)
               + jnp.dot(p_agg, wgp, preferred_element_type=jnp.float32)
               + jnp.dot(c_agg, wgc, preferred_element_type=jnp.float32)
               + bg)
        return jnp.maximum(out, 0.0)

    def l2_normalize(x):
        # Matches torch F.normalize(p=2, eps=1e-12):
        # rsqrt(max(ssq, 1e-24)) == 1 / max(||x||_2, 1e-12)
        ssq = jnp.sum(x * x, axis=-1, keepdims=True)
        return x * jax.lax.rsqrt(jnp.maximum(ssq, jnp.float32(1e-24)))

    mask_ph = neigh_mask(0, p_h_ref.shape[1])
    mask_ch = neigh_mask(1, c_h_ref.shape[1])
    mask_pt = neigh_mask(2, p_t_ref.shape[1])
    mask_ct = neigh_mask(3, c_t_ref.shape[1])

    h = aggregate(s_h_ref[...].astype(jnp.float32),
                  p_h_ref[...].astype(jnp.float32),
                  c_h_ref[...].astype(jnp.float32),
                  mask_ph, mask_ch)
    t = aggregate(s_t_ref[...].astype(jnp.float32),
                  p_t_ref[...].astype(jnp.float32),
                  c_t_ref[...].astype(jnp.float32),
                  mask_pt, mask_ct)
    r = r_ref[...].astype(jnp.float32)

    d = l2_normalize(h) + l2_normalize(r) - l2_normalize(t)
    # p = 1 norm; compact (TB, 1) store -> only 4 B of HBM write per batch row.
    out_ref[...] = jnp.sum(jnp.abs(d), axis=-1, keepdims=True)


# ------------------------------- wrapper --------------------------------------

def fused_forward(emb_s_h, emb_p_h, emb_c_h, lens_ph, lens_ch,
                  emb_s_t, emb_p_t, emb_c_t, lens_pt, lens_ct,
                  r_emb, params, *, block_b=None):
    B, D = emb_s_h.shape
    LP = emb_p_h.shape[1]
    LC = emb_c_h.shape[1]

    if block_b is None:
        # Double-buffered per-step input (lane-padded in VMEM) at 512 rows is
        # ~18 MiB, which fits the 32 MiB scoped-VMEM limit requested below on
        # all of v5e / v6e / v7x.
        block_b = min(_round_up(B, 8), 512)
        # Prefer >= 2 grid steps so ("parallel",) can shard the batch across
        # v7x's two TensorCores.
        if B > 16 and _round_up(B, block_b) == block_b:
            block_b = _round_up((block_b + 1) // 2, 8)
    Bp = _round_up(B, block_b)
    pad = Bp - B

    def pad_b(x):
        return x if pad == 0 else jnp.pad(x, [(0, pad)] + [(0, 0)] * (x.ndim - 1))

    # All four valid-length vectors packed into a single (B, 4) int32 input.
    lens_all = pad_b(jnp.stack([lens_ph, lens_ch, lens_pt, lens_ct],
                               axis=1).astype(jnp.int32))
    embs = [pad_b(e) for e in (emb_s_h, emb_p_h, emb_c_h,
                               emb_s_t, emb_p_t, emb_c_t, r_emb)]

    args = (lens_all, *embs,
            params["v_p_s"], params["v_p_n"], params["v_c_s"], params["v_c_n"],
            params["wg_s"], params["wg_p"], params["wg_c"], params["bg"])

    tile2 = lambda d: pl.BlockSpec((block_b, d), lambda i: (i, 0))
    tile3 = lambda l, d: pl.BlockSpec((block_b, l, d), lambda i: (i, 0, 0))
    resident = lambda r, c: pl.BlockSpec((r, c), lambda i: (0, 0))

    in_specs = (
        [tile2(4),
         tile2(D), tile3(LP, D), tile3(LC, D),
         tile2(D), tile3(LP, D), tile3(LC, D),
         tile2(D)]
        + [resident(1, D)] * 4          # v_p_s, v_p_n, v_c_s, v_c_n
        + [resident(D, D)] * 3          # wg_s, wg_p, wg_c
        + [resident(1, D)]              # bg
    )

    flops = int(Bp) * (12 * D * D + 10 * (LP + LC) * D + 24 * D)
    transcendentals = int(Bp) * (2 * (LP + LC) + 10)
    bytes_accessed = int(sum(a.size * a.dtype.itemsize for a in args) + Bp * 4)

    out = pl.pallas_call(
        fused_kernel,
        out_shape=jax.ShapeDtypeStruct((Bp, 1), jnp.float32),
        grid=(Bp // block_b,),
        in_specs=in_specs,
        out_specs=pl.BlockSpec((block_b, 1), lambda i: (i, 0)),
        compiler_params=pltpu.CompilerParams(
            dimension_semantics=("parallel",),
            vmem_limit_bytes=32 * 1024 * 1024),
        cost_estimate=pl.CostEstimate(
            flops=flops, transcendentals=transcendentals,
            bytes_accessed=bytes_accessed),
    )(*args)
    return out[:B, 0]


def att_taxo_transe_forward(triples, taxo_h, taxo_t, ent_emb, rel_emb, params):
    """triples: (B, 3) int32; taxo_* = (parents, lens_p, children, lens_c)."""
    # TODO(synk): gathers stay in XLA (see module-level note) but now move
    # unpadded bf16 rows, ~8x less HBM traffic than the padded-f32 layout.
    parents_h, lens_ph, children_h, lens_ch = taxo_h
    parents_t, lens_pt, children_t, lens_ct = taxo_t
    r = jnp.take(rel_emb, triples[:, 1], axis=0)
    emb_s_h = jnp.take(ent_emb, triples[:, 0], axis=0)
    emb_p_h = jnp.take(ent_emb, parents_h, axis=0)
    emb_c_h = jnp.take(ent_emb, children_h, axis=0)
    emb_s_t = jnp.take(ent_emb, triples[:, 2], axis=0)
    emb_p_t = jnp.take(ent_emb, parents_t, axis=0)
    emb_c_t = jnp.take(ent_emb, children_t, axis=0)
    return fused_forward(emb_s_h, emb_p_h, emb_c_h, lens_ph, lens_ch,
                         emb_s_t, emb_p_t, emb_c_t, lens_pt, lens_ct,
                         r, params)


# ------------------------------- params ---------------------------------------

def init_params(key, ent_count, rel_count, dim, attn_dim):
    ks = jax.random.split(key, 8)
    ent_emb = jax.random.normal(ks[0], (ent_count, dim), jnp.float32)
    ent_emb = ent_emb.at[0].set(0.0)                       # padding_idx = 0
    rel_emb = jax.random.normal(ks[1], (rel_count, dim), jnp.float32)

    # PyTorch Linear weights: (out, in)
    w1p = 0.1 * jax.random.normal(ks[2], (attn_dim, 2 * dim), jnp.float32)
    w2p = 0.1 * jax.random.normal(ks[3], (1, attn_dim), jnp.float32)
    w1c = 0.1 * jax.random.normal(ks[4], (attn_dim, 2 * dim), jnp.float32)
    w2c = 0.1 * jax.random.normal(ks[5], (1, attn_dim), jnp.float32)
    wg = 0.1 * jax.random.normal(ks[6], (dim, 3 * dim), jnp.float32)
    bg = 0.1 * jax.random.normal(ks[7], (dim,), jnp.float32)

    # Fold the two bias-free attention Linears (LeakyReLU is applied AFTER both
    # in the reference module, so the fold is exact):
    #   score(x) = x @ W1^T @ W2^T = x @ (W2 @ W1)^T, split self/neighbor halves.
    v_p = w2p @ w1p          # (1, 2*dim)
    v_c = w2c @ w1c
    params = dict(
        v_p_s=v_p[:, :dim], v_p_n=v_p[:, dim:],
        v_c_s=v_c[:, :dim], v_c_n=v_c[:, dim:],
        # emb_generator Linear(3D->D): y = cat([(1+eps)s, p, c]) @ wg^T + bg,
        # split into per-chunk (D, D) factors; (1+eps) folded into wg_s offline.
        wg_s=(1.0 + EPS) * jnp.transpose(wg[:, :dim]),
        wg_p=jnp.transpose(wg[:, dim:2 * dim]),
        wg_c=jnp.transpose(wg[:, 2 * dim:]),
        bg=bg.reshape(1, dim),
    )
    # Unpadded bf16 storage: ~8x less HBM read traffic than f32 padded-to-128.
    return ent_emb.astype(EMB_DTYPE), rel_emb.astype(EMB_DTYPE), params


# ------------------------------- main ------------------------------------------

if __name__ == "__main__":
    B, LP, LC = 8, 8, 8
    ENT_COUNT, REL_COUNT = 64, 16

    key = jax.random.PRNGKey(0)
    (k_param, k_tri, k_ph, k_ch, k_pt, k_ct,
     k_lph, k_lch, k_lpt, k_lct) = jax.random.split(key, 10)

    ent_emb, rel_emb, params = init_params(
        k_param, ENT_COUNT, REL_COUNT, DIM, ATTN_DIM)

    heads = jax.random.randint(k_tri, (B,), 1, ENT_COUNT)
    rels = jax.random.randint(jax.random.fold_in(k_tri, 1), (B,), 0, REL_COUNT)
    tails = jax.random.randint(jax.random.fold_in(k_tri, 2), (B,), 1, ENT_COUNT)
    triples = jnp.stack([heads, rels, tails], axis=1).astype(jnp.int32)

    # synthetic taxonomy neighborhoods (stand-in for prepare_batch_taxo_ents)
    parents_h = jax.random.randint(k_ph, (B, LP), 1, ENT_COUNT).astype(jnp.int32)
    children_h = jax.random.randint(k_ch, (B, LC), 1, ENT_COUNT).astype(jnp.int32)
    parents_t = jax.random.randint(k_pt, (B, LP), 1, ENT_COUNT).astype(jnp.int32)
    children_t = jax.random.randint(k_ct, (B, LC), 1, ENT_COUNT).astype(jnp.int32)
    lens_ph = jax.random.randint(k_lph, (B,), 1, LP + 1).astype(jnp.int32)
    lens_ch = jax.random.randint(k_lch, (B,), 1, LC + 1).astype(jnp.int32)
    lens_pt = jax.random.randint(k_lpt, (B,), 1, LP + 1).astype(jnp.int32)
    lens_ct = jax.random.randint(k_lct, (B,), 1, LC + 1).astype(jnp.int32)

    taxo_h = (parents_h, lens_ph, children_h, lens_ch)
    taxo_t = (parents_t, lens_pt, children_t, lens_ct)

    scores = att_taxo_transe_forward(triples, taxo_h, taxo_t,
                                     ent_emb, rel_emb, params)
    scores = jax.block_until_ready(scores)
    assert scores.shape == (B,)
    assert bool(jnp.all(jnp.isfinite(scores)))
    print("KERNEL_OK")
</pallas_src>

<mosaic_0001>
module attributes {stable_mosaic.version = 11 : i64} {
  func.func @fused_kernel(%arg0: i32, %arg1: memref<8x4xi32, #tpu.memory_space<vmem>>, %arg2: memref<8x32xbf16, #tpu.memory_space<vmem>>, %arg3: memref<8x8x32xbf16, #tpu.memory_space<vmem>>, %arg4: memref<8x8x32xbf16, #tpu.memory_space<vmem>>, %arg5: memref<8x32xbf16, #tpu.memory_space<vmem>>, %arg6: memref<8x8x32xbf16, #tpu.memory_space<vmem>>, %arg7: memref<8x8x32xbf16, #tpu.memory_space<vmem>>, %arg8: memref<8x32xbf16, #tpu.memory_space<vmem>>, %arg9: memref<1x32xf32, #tpu.memory_space<vmem>>, %arg10: memref<1x32xf32, #tpu.memory_space<vmem>>, %arg11: memref<1x32xf32, #tpu.memory_space<vmem>>, %arg12: memref<1x32xf32, #tpu.memory_space<vmem>>, %arg13: memref<32x32xf32, #tpu.memory_space<vmem>>, %arg14: memref<32x32xf32, #tpu.memory_space<vmem>>, %arg15: memref<32x32xf32, #tpu.memory_space<vmem>>, %arg16: memref<1x32xf32, #tpu.memory_space<vmem>>, %arg17: memref<8x1xf32, #tpu.memory_space<vmem>>) attributes {dimension_semantics = [#tpu.dimension_semantics<parallel>], iteration_bounds = array<i64: 1>, scalar_prefetch = 0 : i64, scratch_operands = 0 : i64, tpu.core_type = #tpu.core_type<tc>, window_params = [{transform_indices = @transform_0, window_bounds = array<i64: 8, 4>}, {transform_indices = @transform_1, window_bounds = array<i64: 8, 32>}, {transform_indices = @transform_2, window_bounds = array<i64: 8, 8, 32>}, {transform_indices = @transform_3, window_bounds = array<i64: 8, 8, 32>}, {transform_indices = @transform_4, window_bounds = array<i64: 8, 32>}, {transform_indices = @transform_5, window_bounds = array<i64: 8, 8, 32>}, {transform_indices = @transform_6, window_bounds = array<i64: 8, 8, 32>}, {transform_indices = @transform_7, window_bounds = array<i64: 8, 32>}, {pipeline_mode = #tpu.pipeline_mode<synchronous>, transform_indices = @transform_8, window_bounds = array<i64: 1, 32>}, {pipeline_mode = #tpu.pipeline_mode<synchronous>, transform_indices = @transform_9, window_bounds = array<i64: 1, 32>}, {pipeline_mode = #tpu.pipeline_mode<synchronous>, transform_indices = @transform_10, window_bounds = array<i64: 1, 32>}, {pipeline_mode = #tpu.pipeline_mode<synchronous>, transform_indices = @transform_11, window_bounds = array<i64: 1, 32>}, {pipeline_mode = #tpu.pipeline_mode<synchronous>, transform_indices = @transform_12, window_bounds = array<i64: 32, 32>}, {pipeline_mode = #tpu.pipeline_mode<synchronous>, transform_indices = @transform_13, window_bounds = array<i64: 32, 32>}, {pipeline_mode = #tpu.pipeline_mode<synchronous>, transform_indices = @transform_14, window_bounds = array<i64: 32, 32>}, {pipeline_mode = #tpu.pipeline_mode<synchronous>, transform_indices = @transform_15, window_bounds = array<i64: 1, 32>}, {transform_indices = @transform_16, window_bounds = array<i64: 8, 1>}]} {
    %c0 = arith.constant 0 : index
    %c0_0 = arith.constant 0 : index
    %0 = vector.load %arg9[%c0, %c0_0] : memref<1x32xf32, #tpu.memory_space<vmem>>, vector<1x32xf32>
    %c0_1 = arith.constant 0 : index
    %c0_2 = arith.constant 0 : index
    %1 = vector.load %arg10[%c0_1, %c0_2] : memref<1x32xf32, #tpu.memory_space<vmem>>, vector<1x32xf32>
    %c0_3 = arith.constant 0 : index
    %c0_4 = arith.constant 0 : index
    %2 = vector.load %arg11[%c0_3, %c0_4] : memref<1x32xf32, #tpu.memory_space<vmem>>, vector<1x32xf32>
    %c0_5 = arith.constant 0 : index
    %c0_6 = arith.constant 0 : index
    %3 = vector.load %arg12[%c0_5, %c0_6] : memref<1x32xf32, #tpu.memory_space<vmem>>, vector<1x32xf32>
    %c0_7 = arith.constant 0 : index
    %c0_8 = arith.constant 0 : index
    %4 = vector.load %arg13[%c0_7, %c0_8] : memref<32x32xf32, #tpu.memory_space<vmem>>, vector<32x32xf32>
    %c0_9 = arith.constant 0 : index
    %c0_10 = arith.constant 0 : index
    %5 = vector.load %arg14[%c0_9, %c0_10] : memref<32x32xf32, #tpu.memory_space<vmem>>, vector<32x32xf32>
    %c0_11 = arith.constant 0 : index
    %c0_12 = arith.constant 0 : index
    %6 = vector.load %arg15[%c0_11, %c0_12] : memref<32x32xf32, #tpu.memory_space<vmem>>, vector<32x32xf32>
    %c0_13 = arith.constant 0 : index
    %c0_14 = arith.constant 0 : index
    %7 = vector.load %arg16[%c0_13, %c0_14] : memref<1x32xf32, #tpu.memory_space<vmem>>, vector<1x32xf32>
    %c0_15 = arith.constant 0 : index
    %c0_16 = arith.constant 0 : index
    %8 = vector.load %arg1[%c0_15, %c0_16] : memref<8x4xi32, #tpu.memory_space<vmem>>, vector<8x4xi32>
    %9 = tpu.iota {dimensions = array<i32: 1>} : vector<8x8xi32>
    %10 = vector.extract_strided_slice %8 {offsets = [0, 0], sizes = [8, 1], strides = [1, 1]} : vector<8x4xi32> to vector<8x1xi32>
    %11 = vector.broadcast %10 : vector<8x1xi32> to vector<8x8xi32>
    %12 = arith.cmpi slt, %9, %11 : vector<8x8xi32>
    %13 = tpu.iota {dimensions = array<i32: 1>} : vector<8x8xi32>
    %14 = vector.extract_strided_slice %8 {offsets = [0, 1], sizes = [8, 1], strides = [1, 1]} : vector<8x4xi32> to vector<8x1xi32>
    %15 = vector.broadcast %14 : vector<8x1xi32> to vector<8x8xi32>
    %16 = arith.cmpi slt, %13, %15 : vector<8x8xi32>
    %17 = tpu.iota {dimensions = array<i32: 1>} : vector<8x8xi32>
    %18 = vector.extract_strided_slice %8 {offsets = [0, 2], sizes = [8, 1], strides = [1, 1]} : vector<8x4xi32> to vector<8x1xi32>
    %19 = vector.broadcast %18 : vector<8x1xi32> to vector<8x8xi32>
    %20 = arith.cmpi slt, %17, %19 : vector<8x8xi32>
    %21 = tpu.iota {dimensions = array<i32: 1>} : vector<8x8xi32>
    %22 = vector.extract_strided_slice %8 {offsets = [0, 3], sizes = [8, 1], strides = [1, 1]} : vector<8x4xi32> to vector<8x1xi32>
    %23 = vector.broadcast %22 : vector<8x1xi32> to vector<8x8xi32>
    %24 = arith.cmpi slt, %21, %23 : vector<8x8xi32>
    %c0_17 = arith.constant 0 : index
    %c0_18 = arith.constant 0 : index
    %25 = vector.load %arg2[%c0_17, %c0_18] : memref<8x32xbf16, #tpu.memory_space<vmem>>, vector<8x32xbf16>
    %26 = arith.extf %25 : vector<8x32xbf16> to vector<8x32xf32>
    %c0_19 = arith.constant 0 : index
    %c0_20 = arith.constant 0 : index
    %c0_21 = arith.constant 0 : index
    %27 = vector.load %arg3[%c0_19, %c0_20, %c0_21] : memref<8x8x32xbf16, #tpu.memory_space<vmem>>, vector<8x8x32xbf16>
    %28 = arith.extf %27 : vector<8x8x32xbf16> to vector<8x8x32xf32>
    %c0_22 = arith.constant 0 : index
    %c0_23 = arith.constant 0 : index
    %c0_24 = arith.constant 0 : index
    %29 = vector.load %arg4[%c0_22, %c0_23, %c0_24] : memref<8x8x32xbf16, #tpu.memory_space<vmem>>, vector<8x8x32xbf16>
    %30 = arith.extf %29 : vector<8x8x32xbf16> to vector<8x8x32xf32>
    %31 = vector.broadcast %0 : vector<1x32xf32> to vector<8x32xf32>
    %32 = arith.mulf %26, %31 : vector<8x32xf32>
    %cst = arith.constant dense<0.000000e+00> : vector<8xf32>
    %33 = vector.multi_reduction <add>, %32, %cst [1] : vector<8x32xf32> to vector<8xf32>
    %34 = vector.shape_cast %33 : vector<8xf32> to vector<8x1xf32>
    %35 = vector.shape_cast %1 : vector<1x32xf32> to vector<1x1x32xf32>
    %36 = vector.broadcast %35 : vector<1x1x32xf32> to vector<8x8x32xf32>
    %37 = arith.mulf %28, %36 : vector<8x8x32xf32>
    %cst_25 = arith.constant dense<0.000000e+00> : vector<8x8xf32>
    %38 = vector.multi_reduction <add>, %37, %cst_25 [2] : vector<8x8x32xf32> to vector<8x8xf32>
    %39 = vector.broadcast %34 : vector<8x1xf32> to vector<8x8xf32>
    %40 = arith.addf %38, %39 : vector<8x8xf32>
    %cst_26 = arith.constant 0.000000e+00 : f32
    %41 = vector.broadcast %cst_26 : f32 to vector<8x8xf32>
    %42 = arith.cmpf oge, %40, %41 : vector<8x8xf32>
    %cst_27 = arith.constant 2.000000e-01 : f32
    %43 = vector.broadcast %cst_27 : f32 to vector<8x8xf32>
    %44 = arith.mulf %43, %40 : vector<8x8xf32>
    %45 = arith.select %42, %40, %44 : vector<8x8xi1>, vector<8x8xf32>
    %cst_28 = arith.constant -1.000000e+30 : f32
    %46 = vector.broadcast %cst_28 : f32 to vector<8x8xf32>
    %47 = arith.select %12, %45, %46 : vector<8x8xi1>, vector<8x8xf32>
    %cst_29 = arith.constant dense<0xFF800000> : vector<8xf32>
    %48 = vector.multi_reduction <maximumf>, %47, %cst_29 [1] : vector<8x8xf32> to vector<8xf32>
    %49 = vector.shape_cast %48 : vector<8xf32> to vector<8x1xf32>
    %50 = vector.broadcast %49 : vector<8x1xf32> to vector<8x8xf32>
    %51 = arith.subf %47, %50 : vector<8x8xf32>
    %52 = math.exp %51 : vector<8x8xf32>
    %cst_30 = arith.constant dense<0.000000e+00> : vector<8xf32>
    %53 = vector.multi_reduction <add>, %52, %cst_30 [1] : vector<8x8xf32> to vector<8xf32>
    %54 = vector.shape_cast %53 : vector<8xf32> to vector<8x1xf32>
    %55 = tpu.reciprocal %54 {approx = true} : vector<8x1xf32> -> vector<8x1xf32>
    %56 = vector.broadcast %55 : vector<8x1xf32> to vector<8x8xf32>
    %57 = arith.mulf %52, %56 : vector<8x8xf32>
    %58 = vector.shape_cast %57 : vector<8x8xf32> to vector<8x8x1xf32>
    %59 = vector.broadcast %58 : vector<8x8x1xf32> to vector<8x8x32xf32>
    %60 = arith.mulf %59, %28 : vector<8x8x32xf32>
    %cst_31 = arith.constant dense<0.000000e+00> : vector<8x32xf32>
    %61 = vector.multi_reduction <add>, %60, %cst_31 [1] : vector<8x8x32xf32> to vector<8x32xf32>
    %62 = vector.broadcast %2 : vector<1x32xf32> to vector<8x32xf32>
    %63 = arith.mulf %26, %62 : vector<8x32xf32>
    %cst_32 = arith.constant dense<0.000000e+00> : vector<8xf32>
    %64 = vector.multi_reduction <add>, %63, %cst_32 [1] : vector<8x32xf32> to vector<8xf32>
    %65 = vector.shape_cast %64 : vector<8xf32> to vector<8x1xf32>
    %66 = vector.shape_cast %3 : vector<1x32xf32> to vector<1x1x32xf32>
    %67 = vector.broadcast %66 : vector<1x1x32xf32> to vector<8x8x32xf32>
    %68 = arith.mulf %30, %67 : vector<8x8x32xf32>
    %cst_33 = arith.constant dense<0.000000e+00> : vector<8x8xf32>
    %69 = vector.multi_reduction <add>, %68, %cst_33 [2] : vector<8x8x32xf32> to vector<8x8xf32>
    %70 = vector.broadcast %65 : vector<8x1xf32> to vector<8x8xf32>
    %71 = arith.addf %69, %70 : vector<8x8xf32>
    %cst_34 = arith.constant 0.000000e+00 : f32
    %72 = vector.broadcast %cst_34 : f32 to vector<8x8xf32>
    %73 = arith.cmpf oge, %71, %72 : vector<8x8xf32>
    %cst_35 = arith.constant 2.000000e-01 : f32
    %74 = vector.broadcast %cst_35 : f32 to vector<8x8xf32>
    %75 = arith.mulf %74, %71 : vector<8x8xf32>
    %76 = arith.select %73, %71, %75 : vector<8x8xi1>, vector<8x8xf32>
    %cst_36 = arith.constant -1.000000e+30 : f32
    %77 = vector.broadcast %cst_36 : f32 to vector<8x8xf32>
    %78 = arith.select %16, %76, %77 : vector<8x8xi1>, vector<8x8xf32>
    %cst_37 = arith.constant dense<0xFF800000> : vector<8xf32>
    %79 = vector.multi_reduction <maximumf>, %78, %cst_37 [1] : vector<8x8xf32> to vector<8xf32>
    %80 = vector.shape_cast %79 : vector<8xf32> to vector<8x1xf32>
    %81 = vector.broadcast %80 : vector<8x1xf32> to vector<8x8xf32>
    %82 = arith.subf %78, %81 : vector<8x8xf32>
    %83 = math.exp %82 : vector<8x8xf32>
    %cst_38 = arith.constant dense<0.000000e+00> : vector<8xf32>
    %84 = vector.multi_reduction <add>, %83, %cst_38 [1] : vector<8x8xf32> to vector<8xf32>
    %85 = vector.shape_cast %84 : vector<8xf32> to vector<8x1xf32>
    %86 = tpu.reciprocal %85 {approx = true} : vector<8x1xf32> -> vector<8x1xf32>
    %87 = vector.broadcast %86 : vector<8x1xf32> to vector<8x8xf32>
    %88 = arith.mulf %83, %87 : vector<8x8xf32>
    %89 = vector.shape_cast %88 : vector<8x8xf32> to vector<8x8x1xf32>
    %90 = vector.broadcast %89 : vector<8x8x1xf32> to vector<8x8x32xf32>
    %91 = arith.mulf %90, %30 : vector<8x8x32xf32>
    %cst_39 = arith.constant dense<0.000000e+00> : vector<8x32xf32>
    %92 = vector.multi_reduction <add>, %91, %cst_39 [1] : vector<8x8x32xf32> to vector<8x32xf32>
    %cst_40 = arith.constant dense<0.000000e+00> : vector<8x32xf32>
    %93 = tpu.matmul %26, %4, %cst_40 {dimension_numbers = #tpu.dot_dimension_numbers<[1], [0], [0], [1], [0, 0, 1, 1], [], []>} : vector<8x32xf32>, vector<32x32xf32>, vector<8x32xf32> -> vector<8x32xf32>
    %cst_41 = arith.constant dense<0.000000e+00> : vector<8x32xf32>
    %94 = tpu.matmul %61, %5, %cst_41 {dimension_numbers = #tpu.dot_dimension_numbers<[1], [0], [0], [1], [0, 0, 1, 1], [], []>} : vector<8x32xf32>, vector<32x32xf32>, vector<8x32xf32> -> vector<8x32xf32>
    %95 = arith.addf %93, %94 : vector<8x32xf32>
    %cst_42 = arith.constant dense<0.000000e+00> : vector<8x32xf32>
    %96 = tpu.matmul %92, %6, %cst_42 {dimension_numbers = #tpu.dot_dimension_numbers<[1], [0], [0], [1], [0, 0, 1, 1], [], []>} : vector<8x32xf32>, vector<32x32xf32>, vector<8x32xf32> -> vector<8x32xf32>
    %97 = arith.addf %95, %96 : vector<8x32xf32>
    %98 = vector.broadcast %7 : vector<1x32xf32> to vector<8x32xf32>
    %99 = arith.addf %97, %98 : vector<8x32xf32>
    %cst_43 = arith.constant 0.000000e+00 : f32
    %100 = vector.broadcast %cst_43 : f32 to vector<8x32xf32>
    %101 = arith.maximumf %99, %100 : vector<8x32xf32>
    %c0_44 = arith.constant 0 : index
    %c0_45 = arith.constant 0 : index
    %102 = vector.load %arg5[%c0_44, %c0_45] : memref<8x32xbf16, #tpu.memory_space<vmem>>, vector<8x32xbf16>
    %103 = arith.extf %102 : vector<8x32xbf16> to vector<8x32xf32>
    %c0_46 = arith.constant 0 : index
    %c0_47 = arith.constant 0 : index
    %c0_48 = arith.constant 0 : index
    %104 = vector.load %arg6[%c0_46, %c0_47, %c0_48] : memref<8x8x32xbf16, #tpu.memory_space<vmem>>, vector<8x8x32xbf16>
    %105 = arith.extf %104 : vector<8x8x32xbf16> to vector<8x8x32xf32>
    %c0_49 = arith.constant 0 : index
    %c0_50 = arith.constant 0 : index
    %c0_51 = arith.constant 0 : index
    %106 = vector.load %arg7[%c0_49, %c0_50, %c0_51] : memref<8x8x32xbf16, #tpu.memory_space<vmem>>, vector<8x8x32xbf16>
    %107 = arith.extf %106 : vector<8x8x32xbf16> to vector<8x8x32xf32>
    %108 = vector.broadcast %0 : vector<1x32xf32> to vector<8x32xf32>
    %109 = arith.mulf %103, %108 : vector<8x32xf32>
    %cst_52 = arith.constant dense<0.000000e+00> : vector<8xf32>
    %110 = vector.multi_reduction <add>, %109, %cst_52 [1] : vector<8x32xf32> to vector<8xf32>
    %111 = vector.shape_cast %110 : vector<8xf32> to vector<8x1xf32>
    %112 = vector.shape_cast %1 : vector<1x32xf32> to vector<1x1x32xf32>
    %113 = vector.broadcast %112 : vector<1x1x32xf32> to vector<8x8x32xf32>
    %114 = arith.mulf %105, %113 : vector<8x8x32xf32>
    %cst_53 = arith.constant dense<0.000000e+00> : vector<8x8xf32>
    %115 = vector.multi_reduction <add>, %114, %cst_53 [2] : vector<8x8x32xf32> to vector<8x8xf32>
    %116 = vector.broadcast %111 : vector<8x1xf32> to vector<8x8xf32>
    %117 = arith.addf %115, %116 : vector<8x8xf32>
    %cst_54 = arith.constant 0.000000e+00 : f32
    %118 = vector.broadcast %cst_54 : f32 to vector<8x8xf32>
    %119 = arith.cmpf oge, %117, %118 : vector<8x8xf32>
    %cst_55 = arith.constant 2.000000e-01 : f32
    %120 = vector.broadcast %cst_55 : f32 to vector<8x8xf32>
    %121 = arith.mulf %120, %117 : vector<8x8xf32>
    %122 = arith.select %119, %117, %121 : vector<8x8xi1>, vector<8x8xf32>
    %cst_56 = arith.constant -1.000000e+30 : f32
    %123 = vector.broadcast %cst_56 : f32 to vector<8x8xf32>
    %124 = arith.select %20, %122, %123 : vector<8x8xi1>, vector<8x8xf32>
    %cst_57 = arith.constant dense<0xFF800000> : vector<8xf32>
    %125 = vector.multi_reduction <maximumf>, %124, %cst_57 [1] : vector<8x8xf32> to vector<8xf32>
    %126 = vector.shape_cast %125 : vector<8xf32> to vector<8x1xf32>
    %127 = vector.broadcast %126 : vector<8x1xf32> to vector<8x8xf32>
    %128 = arith.subf %124, %127 : vector<8x8xf32>
    %129 = math.exp %128 : vector<8x8xf32>
    %cst_58 = arith.constant dense<0.000000e+00> : vector<8xf32>
    %130 = vector.multi_reduction <add>, %129, %cst_58 [1] : vector<8x8xf32> to vector<8xf32>
    %131 = vector.shape_cast %130 : vector<8xf32> to vector<8x1xf32>
    %132 = tpu.reciprocal %131 {approx = true} : vector<8x1xf32> -> vector<8x1xf32>
    %133 = vector.broadcast %132 : vector<8x1xf32> to vector<8x8xf32>
    %134 = arith.mulf %129, %133 : vector<8x8xf32>
    %135 = vector.shape_cast %134 : vector<8x8xf32> to vector<8x8x1xf32>
    %136 = vector.broadcast %135 : vector<8x8x1xf32> to vector<8x8x32xf32>
    %137 = arith.mulf %136, %105 : vector<8x8x32xf32>
    %cst_59 = arith.constant dense<0.000000e+00> : vector<8x32xf32>
    %138 = vector.multi_reduction <add>, %137, %cst_59 [1] : vector<8x8x32xf32> to vector<8x32xf32>
    %139 = vector.broadcast %2 : vector<1x32xf32> to vector<8x32xf32>
    %140 = arith.mulf %103, %139 : vector<8x32xf32>
    %cst_60 = arith.constant dense<0.000000e+00> : vector<8xf32>
    %141 = vector.multi_reduction <add>, %140, %cst_60 [1] : vector<8x32xf32> to vector<8xf32>
    %142 = vector.shape_cast %141 : vector<8xf32> to vector<8x1xf32>
    %143 = vector.shape_cast %3 : vector<1x32xf32> to vector<1x1x32xf32>
    %144 = vector.broadcast %143 : vector<1x1x32xf32> to vector<8x8x32xf32>
    %145 = arith.mulf %107, %144 : vector<8x8x32xf32>
    %cst_61 = arith.constant dense<0.000000e+00> : vector<8x8xf32>
    %146 = vector.multi_reduction <add>, %145, %cst_61 [2] : vector<8x8x32xf32> to vector<8x8xf32>
    %147 = vector.broadcast %142 : vector<8x1xf32> to vector<8x8xf32>
    %148 = arith.addf %146, %147 : vector<8x8xf32>
    %cst_62 = arith.constant 0.000000e+00 : f32
    %149 = vector.broadcast %cst_62 : f32 to vector<8x8xf32>
    %150 = arith.cmpf oge, %148, %149 : vector<8x8xf32>
    %cst_63 = arith.constant 2.000000e-01 : f32
    %151 = vector.broadcast %cst_63 : f32 to vector<8x8xf32>
    %152 = arith.mulf %151, %148 : vector<8x8xf32>
    %153 = arith.select %150, %148, %152 : vector<8x8xi1>, vector<8x8xf32>
    %cst_64 = arith.constant -1.000000e+30 : f32
    %154 = vector.broadcast %cst_64 : f32 to vector<8x8xf32>
    %155 = arith.select %24, %153, %154 : vector<8x8xi1>, vector<8x8xf32>
    %cst_65 = arith.constant dense<0xFF800000> : vector<8xf32>
    %156 = vector.multi_reduction <maximumf>, %155, %cst_65 [1] : vector<8x8xf32> to vector<8xf32>
    %157 = vector.shape_cast %156 : vector<8xf32> to vector<8x1xf32>
    %158 = vector.broadcast %157 : vector<8x1xf32> to vector<8x8xf32>
    %159 = arith.subf %155, %158 : vector<8x8xf32>
    %160 = math.exp %159 : vector<8x8xf32>
    %cst_66 = arith.constant dense<0.000000e+00> : vector<8xf32>
    %161 = vector.multi_reduction <add>, %160, %cst_66 [1] : vector<8x8xf32> to vector<8xf32>
    %162 = vector.shape_cast %161 : vector<8xf32> to vector<8x1xf32>
    %163 = tpu.reciprocal %162 {approx = true} : vector<8x1xf32> -> vector<8x1xf32>
    %164 = vector.broadcast %163 : vector<8x1xf32> to vector<8x8xf32>
    %165 = arith.mulf %160, %164 : vector<8x8xf32>
    %166 = vector.shape_cast %165 : vector<8x8xf32> to vector<8x8x1xf32>
    %167 = vector.broadcast %166 : vector<8x8x1xf32> to vector<8x8x32xf32>
    %168 = arith.mulf %167, %107 : vector<8x8x32xf32>
    %cst_67 = arith.constant dense<0.000000e+00> : vector<8x32xf32>
    %169 = vector.multi_reduction <add>, %168, %cst_67 [1] : vector<8x8x32xf32> to vector<8x32xf32>
    %cst_68 = arith.constant dense<0.000000e+00> : vector<8x32xf32>
    %170 = tpu.matmul %103, %4, %cst_68 {dimension_numbers = #tpu.dot_dimension_numbers<[1], [0], [0], [1], [0, 0, 1, 1], [], []>} : vector<8x32xf32>, vector<32x32xf32>, vector<8x32xf32> -> vector<8x32xf32>
    %cst_69 = arith.constant dense<0.000000e+00> : vector<8x32xf32>
    %171 = tpu.matmul %138, %5, %cst_69 {dimension_numbers = #tpu.dot_dimension_numbers<[1], [0], [0], [1], [0, 0, 1, 1], [], []>} : vector<8x32xf32>, vector<32x32xf32>, vector<8x32xf32> -> vector<8x32xf32>
    %172 = arith.addf %170, %171 : vector<8x32xf32>
    %cst_70 = arith.constant dense<0.000000e+00> : vector<8x32xf32>
    %173 = tpu.matmul %169, %6, %cst_70 {dimension_numbers = #tpu.dot_dimension_numbers<[1], [0], [0], [1], [0, 0, 1, 1], [], []>} : vector<8x32xf32>, vector<32x32xf32>, vector<8x32xf32> -> vector<8x32xf32>
    %174 = arith.addf %172, %173 : vector<8x32xf32>
    %175 = vector.broadcast %7 : vector<1x32xf32> to vector<8x32xf32>
    %176 = arith.addf %174, %175 : vector<8x32xf32>
    %cst_71 = arith.constant 0.000000e+00 : f32
    %177 = vector.broadcast %cst_71 : f32 to vector<8x32xf32>
    %178 = arith.maximumf %176, %177 : vector<8x32xf32>
    %c0_72 = arith.constant 0 : index
    %c0_73 = arith.constant 0 : index
    %179 = vector.load %arg8[%c0_72, %c0_73] : memref<8x32xbf16, #tpu.memory_space<vmem>>, vector<8x32xbf16>
    %180 = arith.extf %179 : vector<8x32xbf16> to vector<8x32xf32>
    %181 = arith.mulf %101, %101 : vector<8x32xf32>
    %cst_74 = arith.constant dense<0.000000e+00> : vector<8xf32>
    %182 = vector.multi_reduction <add>, %181, %cst_74 [1] : vector<8x32xf32> to vector<8xf32>
    %183 = vector.shape_cast %182 : vector<8xf32> to vector<8x1xf32>
    %cst_75 = arith.constant 1.000000e-24 : f32
    %184 = vector.broadcast %cst_75 : f32 to vector<8x1xf32>
    %185 = arith.maximumf %183, %184 : vector<8x1xf32>
    %186 = math.rsqrt %185 : vector<8x1xf32>
    %187 = vector.broadcast %186 : vector<8x1xf32> to vector<8x32xf32>
    %188 = arith.mulf %101, %187 : vector<8x32xf32>
    %189 = arith.mulf %180, %180 : vector<8x32xf32>
    %cst_76 = arith.constant dense<0.000000e+00> : vector<8xf32>
    %190 = vector.multi_reduction <add>, %189, %cst_76 [1] : vector<8x32xf32> to vector<8xf32>
    %191 = vector.shape_cast %190 : vector<8xf32> to vector<8x1xf32>
    %cst_77 = arith.constant 1.000000e-24 : f32
    %192 = vector.broadcast %cst_77 : f32 to vector<8x1xf32>
    %193 = arith.maximumf %191, %192 : vector<8x1xf32>
    %194 = math.rsqrt %193 : vector<8x1xf32>
    %195 = vector.broadcast %194 : vector<8x1xf32> to vector<8x32xf32>
    %196 = arith.mulf %180, %195 : vector<8x32xf32>
    %197 = arith.addf %188, %196 : vector<8x32xf32>
    %198 = arith.mulf %178, %178 : vector<8x32xf32>
    %cst_78 = arith.constant dense<0.000000e+00> : vector<8xf32>
    %199 = vector.multi_reduction <add>, %198, %cst_78 [1] : vector<8x32xf32> to vector<8xf32>
    %200 = vector.shape_cast %199 : vector<8xf32> to vector<8x1xf32>
    %cst_79 = arith.constant 1.000000e-24 : f32
    %201 = vector.broadcast %cst_79 : f32 to vector<8x1xf32>
    %202 = arith.maximumf %200, %201 : vector<8x1xf32>
    %203 = math.rsqrt %202 : vector<8x1xf32>
    %204 = vector.broadcast %203 : vector<8x1xf32> to vector<8x32xf32>
    %205 = arith.mulf %178, %204 : vector<8x32xf32>
    %206 = arith.subf %197, %205 : vector<8x32xf32>
    %207 = math.absf %206 : vector<8x32xf32>
    %cst_80 = arith.constant dense<0.000000e+00> : vector<8xf32>
    %208 = vector.multi_reduction <add>, %207, %cst_80 [1] : vector<8x32xf32> to vector<8xf32>
    %209 = vector.shape_cast %208 : vector<8xf32> to vector<8x1xf32>
    %c0_81 = arith.constant 0 : index
    %c0_82 = arith.constant 0 : index
    %210 = vector.load %arg17[%c0_81, %c0_82] : memref<8x1xf32, #tpu.memory_space<vmem>>, vector<8x1xf32>
    tpu.vector_store %arg17[%c0_81, %c0_82], %209 {strides = array<i32>} : memref<8x1xf32, #tpu.memory_space<vmem>>, vector<8x1xf32>,
    return
  }
  func.func @transform_0(%arg0: i32) -> (i32, i32) {
    %c0_i32 = arith.constant 0 : i32
    %c0_i32_0 = arith.constant 0 : i32
    return %arg0, %c0_i32 : i32, i32
  }
  func.func @transform_1(%arg0: i32) -> (i32, i32) {
    %c0_i32 = arith.constant 0 : i32
    %c0_i32_0 = arith.constant 0 : i32
    return %arg0, %c0_i32 : i32, i32
  }
  func.func @transform_2(%arg0: i32) -> (i32, i32, i32) {
    %c0_i32 = arith.constant 0 : i32
    %c0_i32_0 = arith.constant 0 : i32
    %c0_i32_1 = arith.constant 0 : i32
    return %arg0, %c0_i32, %c0_i32_0 : i32, i32, i32
  }
  func.func @transform_3(%arg0: i32) -> (i32, i32, i32) {
    %c0_i32 = arith.constant 0 : i32
    %c0_i32_0 = arith.constant 0 : i32
    %c0_i32_1 = arith.constant 0 : i32
    return %arg0, %c0_i32, %c0_i32_0 : i32, i32, i32
  }
  func.func @transform_4(%arg0: i32) -> (i32, i32) {
    %c0_i32 = arith.constant 0 : i32
    %c0_i32_0 = arith.constant 0 : i32
    return %arg0, %c0_i32 : i32, i32
  }
  func.func @transform_5(%arg0: i32) -> (i32, i32, i32) {
    %c0_i32 = arith.constant 0 : i32
    %c0_i32_0 = arith.constant 0 : i32
    %c0_i32_1 = arith.constant 0 : i32
    return %arg0, %c0_i32, %c0_i32_0 : i32, i32, i32
  }
  func.func @transform_6(%arg0: i32) -> (i32, i32, i32) {
    %c0_i32 = arith.constant 0 : i32
    %c0_i32_0 = arith.constant 0 : i32
    %c0_i32_1 = arith.constant 0 : i32
    return %arg0, %c0_i32, %c0_i32_0 : i32, i32, i32
  }
  func.func @transform_7(%arg0: i32) -> (i32, i32) {
    %c0_i32 = arith.constant 0 : i32
    %c0_i32_0 = arith.constant 0 : i32
    return %arg0, %c0_i32 : i32, i32
  }
  func.func @transform_8(%arg0: i32) -> (i32, i32) {
    %c0_i32 = arith.constant 0 : i32
    %c0_i32_0 = arith.constant 0 : i32
    %c0_i32_1 = arith.constant 0 : i32
    return %c0_i32, %c0_i32_0 : i32, i32
  }
  func.func @transform_9(%arg0: i32) -> (i32, i32) {
    %c0_i32 = arith.constant 0 : i32
    %c0_i32_0 = arith.constant 0 : i32
    %c0_i32_1 = arith.constant 0 : i32
    return %c0_i32, %c0_i32_0 : i32, i32
  }
  func.func @transform_10(%arg0: i32) -> (i32, i32) {
    %c0_i32 = arith.constant 0 : i32
    %c0_i32_0 = arith.constant 0 : i32
    %c0_i32_1 = arith.constant 0 : i32
    return %c0_i32, %c0_i32_0 : i32, i32
  }
  func.func @transform_11(%arg0: i32) -> (i32, i32) {
    %c0_i32 = arith.constant 0 : i32
    %c0_i32_0 = arith.constant 0 : i32
    %c0_i32_1 = arith.constant 0 : i32
    return %c0_i32, %c0_i32_0 : i32, i32
  }
  func.func @transform_12(%arg0: i32) -> (i32, i32) {
    %c0_i32 = arith.constant 0 : i32
    %c0_i32_0 = arith.constant 0 : i32
    %c0_i32_1 = arith.constant 0 : i32
    return %c0_i32, %c0_i32_0 : i32, i32
  }
  func.func @transform_13(%arg0: i32) -> (i32, i32) {
    %c0_i32 = arith.constant 0 : i32
    %c0_i32_0 = arith.constant 0 : i32
    %c0_i32_1 = arith.constant 0 : i32
    return %c0_i32, %c0_i32_0 : i32, i32
  }
  func.func @transform_14(%arg0: i32) -> (i32, i32) {
    %c0_i32 = arith.constant 0 : i32
    %c0_i32_0 = arith.constant 0 : i32
    %c0_i32_1 = arith.constant 0 : i32
    return %c0_i32, %c0_i32_0 : i32, i32
  }
  func.func @transform_15(%arg0: i32) -> (i32, i32) {
    %c0_i32 = arith.constant 0 : i32
    %c0_i32_0 = arith.constant 0 : i32
    %c0_i32_1 = arith.constant 0 : i32
    return %c0_i32, %c0_i32_0 : i32, i32
  }
  func.func @transform_16(%arg0: i32) -> (i32, i32) {
    %c0_i32 = arith.constant 0 : i32
    %c0_i32_0 = arith.constant 0 : i32
    return %arg0, %c0_i32 : i32, i32
  }
}

</mosaic_0001>

<bundles_post_ra>
// kernel: tpu_custom_call.1
= control target key start
LH: loop header
LB: loop body
LE: loop exit
PB: predicated region body
PF: predicated region fallthrough
CT: control target
= control target key end

     0   :  { %s3597_s0 = inlined_call_operand.vmem [shape: s32[8,4], index: 0, kind: input, shape index: {}]   ;;  %s3598_s1 = inlined_call_operand.hbm [shape: bf16[8,32], index: 1, kind: input, shape index: {}]   ;;  %s3599_s2 = inlined_call_operand.hbm [shape: bf16[8,8,32], index: 2, kind: input, shape index: {}]   ;;  %s3600_s3 = inlined_call_operand.hbm [shape: bf16[8,8,32], index: 3, kind: input, shape index: {}]   ;;  %s3601_s4 = inlined_call_operand.hbm [shape: bf16[8,32], index: 4, kind: input, shape index: {}]   ;;  %s3602_s5 = inlined_call_operand.hbm [shape: bf16[8,8,32], index: 5, kind: input, shape index: {}]   ;;  %s3603_s6 = inlined_call_operand.vmem [shape: bf16[8,8,32], index: 6, kind: input, shape index: {}]   ;;  %s3604_s7 = inlined_call_operand.hbm [shape: bf16[8,32], index: 7, kind: input, shape index: {}]   ;;  %s3605_s8 = inlined_call_operand.hbm [shape: f32[1,32], index: 8, kind: input, shape index: {}]   ;;  %s3606_s9 = inlined_call_operand.hbm [shape: f32[1,32], index: 9, kind: input, shape index: {}]   ;;  %s3607_s10 = inlined_call_operand.hbm [shape: f32[1,32], index: 10, kind: input, shape index: {}]   ;;  %s3608_s11 = inlined_call_operand.hbm [shape: f32[1,32], index: 11, kind: input, shape index: {}]   ;;  %s3609_s12 = inlined_call_operand.hbm [shape: f32[32,32], index: 12, kind: input, shape index: {}]   ;;  %s3610_s13 = inlined_call_operand.hbm [shape: f32[32,32], index: 13, kind: input, shape index: {}]   ;;  %s3611_s14 = inlined_call_operand.vmem [shape: f32[32,32], index: 14, kind: input, shape index: {}]   ;;  %s3612_s15 = inlined_call_operand.vmem [shape: f32[1,32], index: 15, kind: input, shape index: {}]   ;;  %s3613_s16 = inlined_call_operand.vmem [shape: f32[8,1], index: 16, kind: output, shape index: {}]  }
   0x1   :  { %3635 = sst [smem:[#allocation28_spill]] %s3597_s0 }
   0x2   :  { %3636 = sst [smem:[#allocation29_spill]] %s3613_s16 }
   0x3   :  { %21 = vsyncpa [#allocation3], 0 }
   0x4   :  { %22 = vsyncpa [#allocation5], 0 }
   0x5   :  { %23 = vsyncpa [#allocation8], 0 }
   0x6   :  { %24 = vsyncpa [#allocation11], 0 }
   0x7   :  { %25 = vsyncpa [#allocation14], 0 }
   0x8   :  { %26 = vsyncpa [#allocation17], 0 }
   0x9   :  { %27 = vsyncpa [#allocation20], 0  ;;  %s2688_s21 = smov [#allocation4]   ;;  %s2410_s25 = scalar_lea.hbm %s3599_s2, 512 }
   0xa   :  { %s45_s22 = sshll.u32 %s2688_s21, 4  ;;  %p2411_p0 = scmp.ne.s32.totalorder %s3599_s2, %s2410_s25  ;;  %s46_s22 = int_to_ptr.vmem [resolvable:$true] %s45_s22 }
   0xb   :  { %p2414_p1 = scmp.lt.u32.totalorder %s2410_s25, %s3599_s2 }
   0xd   :  { %p2416_p2 = pnand %p2414_p1, %p2411_p0 }
   0xf   :  { %2419 = shalt.err (!%p2416_p2)
}
  0x10   :  { %s2420_s30 = scalar_lea.vmem %s46_s22, 512  ;;  %p2425_p4 = scmp.lt.s32.totalorder %s46_s22, %s46_s22 }
  0x11   :  { %p2421_p3 = scmp.ne.s32.totalorder %s46_s22, %s2420_s30  ;;  %p2426_p5 = scmp.lt.s32.totalorder %s2420_s30, %s2420_s30 }
  0x13   :  { %p2427_p6 = por %p2426_p5, %p2425_p4 }
  0x15   :  { %p2428_p7 = pnand %p2427_p6, %p2421_p3 }
  0x17   :  { %2431 = shalt.err (!%p2428_p7)
}
  0x18   :  { %s2689_s0 = smov 64   ;;  %s2690_s17 = smov 4  }
  0x19   :  { %51 = dma.hbm_to_vmem [thread:$0]  %s3599_s2, 512, %s46_s22, [#allocation5], %s2689_s0, %s2689_s0, %s2690_s17  }
  0x1a   :  { %s2691_s20 = smov [#allocation7]   ;;  %s2692_s23 = smov [#allocation10]  }
  0x1b   :  { %s70_s21 = sshll.u32 %s2691_s20, 4  ;;  %s94_s24 = sshll.u32 %s2692_s23, 4  ;;  %s71_s21 = int_to_ptr.vmem [resolvable:$true] %s70_s21  ;;  %s95_s24 = int_to_ptr.vmem [resolvable:$true] %s94_s24 }
  0x1c   :  { %s2432_s27 = scalar_lea.hbm %s3601_s4, 64 }
  0x1d   :  { %p2433_p8 = scmp.ne.s32.totalorder %s3601_s4, %s2432_s27  ;;  %p2436_p9 = scmp.lt.u32.totalorder %s2432_s27, %s3601_s4 }
  0x1f   :  { %p2438_p10 = pnand %p2436_p9, %p2433_p8 }
  0x21   :  { %2441 = shalt.err (!%p2438_p10)
}
  0x22   :  { %s2442_s2 = scalar_lea.vmem %s71_s21, 64  ;;  %p2447_p12 = scmp.lt.s32.totalorder %s71_s21, %s71_s21 }
  0x23   :  { %p2443_p11 = scmp.ne.s32.totalorder %s71_s21, %s2442_s2  ;;  %p2448_p13 = scmp.lt.s32.totalorder %s2442_s2, %s2442_s2 }
  0x25   :  { %p2449_p0 = por %p2448_p13, %p2447_p12 }
  0x27   :  { %p2450_p1 = pnand %p2449_p0, %p2443_p11 }
  0x29   :  { %2453 = shalt.err (!%p2450_p1)
}
  0x2a   :  { %73 = dma.hbm_to_vmem [thread:$0]  %s3601_s4, 64, %s71_s21, [#allocation8]  }
  0x2b   :  { %s2454_s23 = scalar_lea.hbm %s3604_s7, 64 }
  0x2c   :  { %p2455_p2 = scmp.ne.s32.totalorder %s3604_s7, %s2454_s23  ;;  %p2458_p3 = scmp.lt.u32.totalorder %s2454_s23, %s3604_s7 }
  0x2e   :  { %p2460_p4 = pnand %p2458_p3, %p2455_p2 }
  0x30   :  { %2463 = shalt.err (!%p2460_p4)
}
  0x31   :  { %s2464_s28 = scalar_lea.vmem %s95_s24, 64  ;;  %p2469_p6 = scmp.lt.s32.totalorder %s95_s24, %s95_s24 }
  0x32   :  { %p2465_p5 = scmp.ne.s32.totalorder %s95_s24, %s2464_s28  ;;  %p2470_p7 = scmp.lt.s32.totalorder %s2464_s28, %s2464_s28 }
  0x34   :  { %p2471_p8 = por %p2470_p7, %p2469_p6 }
  0x36   :  { %p2472_p9 = pnand %p2471_p8, %p2465_p5 }
  0x38   :  { %2475 = shalt.err (!%p2472_p9)
}
  0x39   :  { %97 = dma.hbm_to_vmem [thread:$0]  %s3604_s7, 64, %s95_s24, [#allocation11]  }
  0x3a   :  { %s2693_s29 = smov [#allocation13]   ;;  %s2694_s2 = smov [#allocation16]  }
  0x3b   :  { %s114_s30 = sshll.u32 %s2693_s29, 4  ;;  %s134_s22 = sshll.u32 %s2694_s2, 4  ;;  %s115_s30 = int_to_ptr.vmem [resolvable:$true] %s114_s30  ;;  %s135_s22 = int_to_ptr.vmem [resolvable:$true] %s134_s22 }
  0x3c   :  { %s2476_s20 = scalar_lea.hbm %s3606_s9, 16 }
  0x3d   :  { %p2477_p10 = scmp.ne.s32.totalorder %s3606_s9, %s2476_s20  ;;  %p2480_p11 = scmp.lt.u32.totalorder %s2476_s20, %s3606_s9 }
  0x3f   :  { %p2482_p12 = pnand %p2480_p11, %p2477_p10 }
  0x41   :  { %2485 = shalt.err (!%p2482_p12)
}
  0x42   :  { %s2486_s7 = scalar_lea.vmem %s115_s30, 16  ;;  %s2490_s24 = scalar_lea.vmem %s115_s30, 32 }
  0x43   :  { %p2487_p13 = scmp.ne.s32.totalorder %s115_s30, %s2486_s7  ;;  %p2491_p0 = scmp.lt.s32.totalorder %s115_s30, %s115_s30 }
  0x44   :  { %p2492_p1 = scmp.lt.s32.totalorder %s2490_s24, %s2486_s7 }
  0x46   :  { %p2493_p2 = por %p2492_p1, %p2491_p0 }
  0x48   :  { %p2494_p3 = pnand %p2493_p2, %p2487_p13 }
  0x4a   :  { %2497 = shalt.err (!%p2494_p3)
}
  0x4b   :  { %117 = dma.hbm_to_vmem [thread:$0]  %s3606_s9, 16, %s115_s30, [#allocation14]  }
  0x4c   :  { %s2498_s29 = scalar_lea.hbm %s3608_s11, 16 }
  0x4d   :  { %p2499_p4 = scmp.ne.s32.totalorder %s3608_s11, %s2498_s29  ;;  %p2502_p5 = scmp.lt.u32.totalorder %s2498_s29, %s3608_s11 }
  0x4f   :  { %p2504_p6 = pnand %p2502_p5, %p2499_p4 }
  0x51   :  { %2507 = shalt.err (!%p2504_p6)
}
  0x52   :  { %s2508_s23 = scalar_lea.vmem %s135_s22, 16  ;;  %s2512_s16 = scalar_lea.vmem %s135_s22, 32 }
  0x53   :  { %p2509_p7 = scmp.ne.s32.totalorder %s135_s22, %s2508_s23  ;;  %p2513_p8 = scmp.lt.s32.totalorder %s135_s22, %s135_s22 }
  0x54   :  { %p2514_p9 = scmp.lt.s32.totalorder %s2512_s16, %s2508_s23 }
  0x56   :  { %p2515_p10 = por %p2514_p9, %p2513_p8 }
  0x58   :  { %p2516_p11 = pnand %p2515_p10, %p2509_p7 }
  0x5a   :  { %2519 = shalt.err (!%p2516_p11)
}
  0x5b   :  { %137 = dma.hbm_to_vmem [thread:$0]  %s3608_s11, 16, %s135_s22, [#allocation17]  }
  0x5c   :  { %s2695_s25 = smov [#allocation2]   ;;  %s2696_s7 = smov [#allocation6]  }
  0x5d   :  { %s36_s26 = sshll.u32 %s2695_s25, 4  ;;  %s57_s24 = sshll.u32 %s2696_s7, 4  ;;  %s37_s26 = int_to_ptr.vmem [resolvable:$true] %s36_s26  ;;  %s58_s24 = int_to_ptr.vmem [resolvable:$true] %s57_s24 }
  0x5e   :  { %s2520_s4 = scalar_lea.hbm %s3598_s1, 64 }
  0x5f   :  { %p2521_p12 = scmp.ne.s32.totalorder %s3598_s1, %s2520_s4  ;;  %p2524_p13 = scmp.lt.u32.totalorder %s2520_s4, %s3598_s1 }
  0x61   :  { %p2526_p0 = pnand %p2524_p13, %p2521_p12 }
  0x63   :  { %2529 = shalt.err (!%p2526_p0)
}
  0x64   :  { %s2530_s11 = scalar_lea.vmem %s37_s26, 64  ;;  %p2535_p2 = scmp.lt.s32.totalorder %s37_s26, %s37_s26 }
  0x65   :  { %p2531_p1 = scmp.ne.s32.totalorder %s37_s26, %s2530_s11  ;;  %p2536_p3 = scmp.lt.s32.totalorder %s2530_s11, %s2530_s11 }
  0x67   :  { %p2537_p4 = por %p2536_p3, %p2535_p2 }
  0x69   :  { %p2538_p5 = pnand %p2537_p4, %p2531_p1 }
  0x6b   :  { %2541 = shalt.err (!%p2538_p5)
}
  0x6c   :  { %39 = dma.hbm_to_vmem [thread:$0]  %s3598_s1, 64, %s37_s26, [#allocation3]  }
  0x6d   :  { %s2542_s16 = scalar_lea.hbm %s3600_s3, 512 }
  0x6e   :  { %p2543_p6 = scmp.ne.s32.totalorder %s3600_s3, %s2542_s16  ;;  %p2546_p7 = scmp.lt.u32.totalorder %s2542_s16, %s3600_s3 }
  0x70   :  { %p2548_p8 = pnand %p2546_p7, %p2543_p6 }
  0x72   :  { %2551 = shalt.err (!%p2548_p8)
}
  0x73   :  { %s2552_s27 = scalar_lea.vmem %s58_s24, 512  ;;  %p2557_p10 = scmp.lt.s32.totalorder %s58_s24, %s58_s24 }
  0x74   :  { %p2553_p9 = scmp.ne.s32.totalorder %s58_s24, %s2552_s27  ;;  %p2558_p11 = scmp.lt.s32.totalorder %s2552_s27, %s2552_s27 }
  0x76   :  { %p2559_p12 = por %p2558_p11, %p2557_p10 }
  0x78   :  { %p2560_p13 = pnand %p2559_p12, %p2553_p9 }
  0x7a   :  { %2563 = shalt.err (!%p2560_p13)
}
  0x7b   :  { %63 = dma.hbm_to_vmem [thread:$0]  %s3600_s3, 512, %s58_s24, [#allocation5], %s2689_s0, %s2689_s0, %s2690_s17  }
  0x7c   :  { %s2697_s28 = smov [#allocation9]   ;;  %s2698_s21 = smov [#allocation12]  }
  0x7d   :  { %s79_s4 = sshll.u32 %s2697_s28, 4  ;;  %s104_s29 = sshll.u32 %s2698_s21, 4  ;;  %s80_s4 = int_to_ptr.vmem [resolvable:$true] %s79_s4  ;;  %s105_s29 = int_to_ptr.vmem [resolvable:$true] %s104_s29 }
  0x7e   :  { %s2564_s11 = scalar_lea.hbm %s3602_s5, 512 }
  0x7f   :  { %p2565_p0 = scmp.ne.s32.totalorder %s3602_s5, %s2564_s11  ;;  %p2568_p1 = scmp.lt.u32.totalorder %s2564_s11, %s3602_s5 }
  0x81   :  { %p2570_p2 = pnand %p2568_p1, %p2565_p0 }
  0x83   :  { %2573 = shalt.err (!%p2570_p2)
}
  0x84   :  { %s2574_s3 = scalar_lea.vmem %s80_s4, 512  ;;  %p2579_p4 = scmp.lt.s32.totalorder %s80_s4, %s80_s4 }
  0x85   :  { %p2575_p3 = scmp.ne.s32.totalorder %s80_s4, %s2574_s3  ;;  %p2580_p5 = scmp.lt.s32.totalorder %s2574_s3, %s2574_s3 }
  0x87   :  { %p2581_p6 = por %p2580_p5, %p2579_p4 }
  0x89   :  { %p2582_p7 = pnand %p2581_p6, %p2575_p3 }
  0x8b   :  { %2585 = shalt.err (!%p2582_p7)
}
  0x8c   :  { %85 = dma.hbm_to_vmem [thread:$0]  %s3602_s5, 512, %s80_s4, [#allocation8], %s2689_s0, %s2689_s0, %s2690_s17  }
  0x8d   :  { %s2586_s25 = scalar_lea.hbm %s3605_s8, 16 }
  0x8e   :  { %p2587_p8 = scmp.ne.s32.totalorder %s3605_s8, %s2586_s25  ;;  %p2590_p9 = scmp.lt.u32.totalorder %s2586_s25, %s3605_s8 }
  0x90   :  { %p2592_p10 = pnand %p2590_p9, %p2587_p8 }
  0x92   :  { %2595 = shalt.err (!%p2592_p10)
}
  0x93   :  { %s2596_s28 = scalar_lea.vmem %s105_s29, 16  ;;  %s2600_s21 = scalar_lea.vmem %s105_s29, 32 }
  0x94   :  { %p2597_p11 = scmp.ne.s32.totalorder %s105_s29, %s2596_s28  ;;  %p2601_p12 = scmp.lt.s32.totalorder %s105_s29, %s105_s29 }
  0x95   :  { %p2602_p13 = scmp.lt.s32.totalorder %s2600_s21, %s2596_s28 }
  0x97   :  { %p2603_p0 = por %p2602_p13, %p2601_p12 }
  0x99   :  { %p2604_p1 = pnand %p2603_p0, %p2597_p11 }
  0x9b   :  { %2607 = shalt.err (!%p2604_p1)
}
  0x9c   :  { %107 = dma.hbm_to_vmem [thread:$0]  %s3605_s8, 16, %s105_s29, [#allocation11]  }
  0x9d   :  { %s2699_s17 = smov [#allocation15]   ;;  %s2700_s2 = smov [#allocation18]  }
  0x9e   :  { %s124_s4 = sshll.u32 %s2699_s17, 4  ;;  %s143_s18 = sshll.u32 %s2700_s2, 4  ;;  %s125_s4 = int_to_ptr.vmem [resolvable:$true] %s124_s4  ;;  %s144_s18 = int_to_ptr.vmem [resolvable:$true] %s143_s18 }
  0x9f   :  { %s2608_s19 = scalar_lea.hbm %s3607_s10, 16 }
  0xa0   :  { %p2609_p2 = scmp.ne.s32.totalorder %s3607_s10, %s2608_s19  ;;  %p2612_p3 = scmp.lt.u32.totalorder %s2608_s19, %s3607_s10 }
  0xa2   :  { %p2614_p4 = pnand %p2612_p3, %p2609_p2 }
  0xa4   :  { %2617 = shalt.err (!%p2614_p4)
}
  0xa5   :  { %s2618_s8 = scalar_lea.vmem %s125_s4, 16  ;;  %s2622_s29 = scalar_lea.vmem %s125_s4, 32 }
  0xa6   :  { %p2619_p5 = scmp.ne.s32.totalorder %s125_s4, %s2618_s8  ;;  %p2623_p6 = scmp.lt.s32.totalorder %s125_s4, %s125_s4 }
  0xa7   :  { %p2624_p7 = scmp.lt.s32.totalorder %s2622_s29, %s2618_s8 }
  0xa9   :  { %p2625_p8 = por %p2624_p7, %p2623_p6 }
  0xab   :  { %p2626_p9 = pnand %p2625_p8, %p2619_p5 }
  0xad   :  { %2629 = shalt.err (!%p2626_p9)
}
  0xae   :  { %127 = dma.hbm_to_vmem [thread:$0]  %s3607_s10, 16, %s125_s4, [#allocation14]  }
  0xaf   :  { %s2630_s7 = scalar_lea.hbm %s3609_s12, 512 }
  0xb0   :  { %p2631_p10 = scmp.ne.s32.totalorder %s3609_s12, %s2630_s7  ;;  %p2634_p11 = scmp.lt.u32.totalorder %s2630_s7, %s3609_s12 }
  0xb2   :  { %p2636_p12 = pnand %p2634_p11, %p2631_p10 }
  0xb4   :  { %2639 = shalt.err (!%p2636_p12)
}
  0xb5   :  { %s2640_s21 = scalar_lea.vmem %s144_s18, 512  ;;  %p2645_p0 = scmp.lt.s32.totalorder %s144_s18, %s144_s18 }
  0xb6   :  { %p2641_p13 = scmp.ne.s32.totalorder %s144_s18, %s2640_s21  ;;  %p2646_p1 = scmp.lt.s32.totalorder %s2640_s21, %s2640_s21 }
  0xb8   :  { %p2647_p2 = por %p2646_p1, %p2645_p0 }
  0xba   :  { %p2648_p3 = pnand %p2647_p2, %p2641_p13 }
  0xbc   :  { %2651 = shalt.err (!%p2648_p3)
}
  0xbd   :  { %s2701_s10 = smov 128   ;;  %s2702_s5 = smov 8  }
  0xbe   :  { %149 = dma.hbm_to_vmem [thread:$0]  %s3609_s12, 512, %s144_s18, [#allocation17], %s2701_s10, %s2701_s10, %s2702_s5  }
  0xbf   :  { %s2703_s4 = smov [#allocation19]   ;;  %s2652_s19 = scalar_lea.hbm %s3610_s13, 512 }
  0xc0   :  { %s155_s2 = sshll.u32 %s2703_s4, 4  ;;  %p2653_p4 = scmp.ne.s32.totalorder %s3610_s13, %s2652_s19  ;;  %s156_s2 = int_to_ptr.vmem [resolvable:$true] %s155_s2 }
  0xc1   :  { %p2656_p5 = scmp.lt.u32.totalorder %s2652_s19, %s3610_s13 }
  0xc3   :  { %p2658_p6 = pnand %p2656_p5, %p2653_p4 }
  0xc5   :  { %2661 = shalt.err (!%p2658_p6)
}
  0xc6   :  { %s2662_s8 = scalar_lea.vmem %s156_s2, 512  ;;  %p2667_p8 = scmp.lt.s32.totalorder %s156_s2, %s156_s2 }
  0xc7   :  { %p2663_p7 = scmp.ne.s32.totalorder %s156_s2, %s2662_s8  ;;  %p2668_p9 = scmp.lt.s32.totalorder %s2662_s8, %s2662_s8 }
  0xc9   :  { %p2669_p10 = por %p2668_p9, %p2667_p8 }
  0xcb   :  { %p2670_p11 = pnand %p2669_p10, %p2663_p7 }
  0xcd   :  { %2673 = shalt.err (!%p2670_p11)
}
  0xce   :  { %161 = dma.hbm_to_vmem [thread:$0]  %s3610_s13, 512, %s156_s2, [#allocation20], %s2701_s10, %s2701_s10, %s2702_s5  }
  0xcf   :  { %2674 = dma.done.wait [#allocation3], 64  }
  0xd0   :  { %2675 = vsyncadd [#allocation3], 4294967232 }
  0xd1   :  { %2676 = dma.done.wait [#allocation5], 1024  }
  0xd2   :  { %2677 = vsyncadd [#allocation5], 4294966272 }
  0xd3   :  { %2678 = dma.done.wait [#allocation8], 576  }
  0xd4   :  { %2679 = vsyncadd [#allocation8], 4294966720 }
  0xd5   :  { %2680 = dma.done.wait [#allocation11], 80  }
  0xd6   :  { %2681 = vsyncadd [#allocation11], 4294967216 }
  0xd7   :  { %2682 = dma.done.wait [#allocation14], 32  }
  0xd8   :  { %2683 = vsyncadd [#allocation14], 4294967264 }
  0xd9   :  { %2684 = dma.done.wait [#allocation17], 528  }
  0xda   :  { %2685 = vsyncadd [#allocation17], 4294966768 }
  0xdb   :  { %2686 = dma.done.wait [#allocation20], 512  }
  0xdc   :  { %2687 = vsyncadd [#allocation20], 4294966784  ;;  %v2704_v0 = vmov 0   ;;  %v2951_v1 = vld [vmem:[#allocation13] ss:$0 sm:$0xff]  ;;  %v2953_v2 = vld [vmem:[#allocation4] sm:$0xff]  }
  0xdd   :  { %2381 = vset.pattern.permute.xlu1 %v2704_v0  ;;  %2384 = vset.pattern.permute.xlu0 %v2704_v0  ;;  %v2139_v3 = vld [vmem:[#allocation12] ss:$0 sm:$0xff]  ;;  %v2153_v4 = vunpack.c.h.bf16 %v2953_v2  ;;  %v238_v5 = vld [vmem:[#allocation2] sm:$0xf]  ;;  %v2152_v7 = vunpack.c.l.bf16 %v2953_v2  ;;  %v2959_v8 = vld [vmem:[#allocation4 + $0x10] sm:$0xff]   ;;  %vm279_vm0 = vcmask 261120  }
  0xde   :  { %v2956_v6 = vld [vmem:[#allocation4 + $0x8] sm:$0xff]   ;;  %v2961_v9 = vunpack.c.l.bf16 %v238_v5  ;;  %v2160_v12 = vunpack.c.l.bf16 %v2959_v8  ;;  %v2976_v17 = vld [vmem:[#allocation4 + $0x18] sm:$0xff]   ;;  %v2161_v25 = vunpack.c.h.bf16 %v2959_v8  ;;  %v3001_v32 = vld [vmem:[#allocation6] sm:$0xff]   ;;  %s3637_s26 = sld [smem:[#allocation28_spill]]  ;;  %s3659_s19 = sld [smem:[#allocation29_spill]] }
  0xdf   :  { %v2156_v10 = vunpack.c.l.bf16 %v2956_v6  ;;  %v290_v11 = vmul.f32 %v2153_v4, %v2951_v1  ;;  %v289_v15 = vmul.f32 %v2152_v7, %v2951_v1  ;;  %v2157_v16 = vunpack.c.h.bf16 %v2956_v6  ;;  %v2998_v30 = vld [vmem:[#allocation15] ss:$0 sm:$0xff]  ;;  %v3011_v38 = vld [vmem:[#allocation16] ss:$0 sm:$0xff]  ;;  %v1187_v41 = vld [vmem:[#allocation7] sm:$0xf] }
  0xe0   :  { %v278_v13 = vmul.f32 %v2139_v3, %v2961_v9  ;;  %v293_v21 = vmul.f32 %v2160_v12, %v2951_v1  ;;  %v2164_v22 = vunpack.c.l.bf16 %v2976_v17  ;;  %v294_v29 = vmul.f32 %v2161_v25, %v2951_v1  ;;  %v3014_v40 = vld [vmem:[#allocation6 + $0x8] sm:$0xff]   ;;  %v3037_v55 = vld [vmem:[#allocation6 + $0x10] sm:$0xff]  }
  0xe1   :  { %v291_v14 = vmul.f32 %v2156_v10, %v2951_v1  ;;  %v300_v18 = vsel %vm279_vm0, %v290_v11, 0.0  ;;  %v297_v23 = vsel %vm279_vm0, %v289_v15, 0.0  ;;  %v292_v24 = vmul.f32 %v2157_v16, %v2951_v1  ;;  %v3027_v48 = vld [vmem:[#allocation9] sm:$0xff]   ;;  %v3049_v62 = vld [vmem:[#allocation9 + $0x8] sm:$0xff]   ;;  %v3061_v15 = vld [vmem:[#allocation6 + $0x18] sm:$0xff]  }
  0xe2   :  { %301 = vadd.xlane.f32.xlu1 %v300_v18  ;;  %v280_v19 = vsel %vm279_vm0, %v278_v13, 0.0  ;;  %v309_v26 = vsel %vm279_vm0, %v293_v21, 0.0  ;;  %v295_v27 = vmul.f32 %v2164_v22, %v2951_v1  ;;  %v2165_v31 = vunpack.c.h.bf16 %v2976_v17 }
  0xe3   :  { %281 = vadd.xlane.f32.xlu0 %v280_v19  ;;  %v303_v20 = vsel %vm279_vm0, %v291_v14, 0.0  ;;  %v306_v28 = vsel %vm279_vm0, %v292_v24, 0.0  ;;  %v612_v34 = vmul.f32 %v2998_v30, %v2961_v9  ;;  %v2169_v35 = vunpack.c.h.bf16 %v3001_v32 }
  0xe4   :  { %v315_v33 = vsel %vm279_vm0, %v295_v27, 0.0  ;;  %v312_v36 = vsel %vm279_vm0, %v294_v29, 0.0  ;;  %v296_v37 = vmul.f32 %v2165_v31, %v2951_v1  ;;  %v2168_v39 = vunpack.c.l.bf16 %v3001_v32 }
  0xe5   :  { %v613_v42 = vsel %vm279_vm0, %v612_v34, 0.0  ;;  %v623_v43 = vmul.f32 %v2169_v35, %v3011_v38  ;;  %v2172_v44 = vunpack.c.l.bf16 %v3014_v40  ;;  %v3025_v47 = vunpack.c.l.bf16 %v1187_v41 }
  0xe6   :  { %304 = vadd.xlane.f32.xlu1 %v303_v20  ;;  %v318_v45 = vsel %vm279_vm0, %v296_v37, 0.0  ;;  %v622_v46 = vmul.f32 %v2168_v39, %v3011_v38  ;;  %v3632_v51 = vunpack.c.l.bf16 %v3027_v48  ;;  %v3634_v54 = vunpack.c.h.bf16 %v3014_v40  ;;  %v3085_v37 = vld [vmem:[#allocation9 + $0x18] sm:$0xff]  }
  0xe7   :  { %298 = vadd.xlane.f32.xlu0 %v297_v23  ;;  %v633_v49 = vsel %vm279_vm0, %v623_v43, 0.0  ;;  %v624_v50 = vmul.f32 %v2172_v44, %v3011_v38  ;;  %v1221_v53 = vmul.f32 %v2139_v3, %v3025_v47  ;;  %v3630_v58 = vunpack.c.l.bf16 %v3037_v55 }
  0xe8   :  { %v630_v52 = vsel %vm279_vm0, %v622_v46, 0.0  ;;  %v1225_v57 = vmul.f32 %v3632_v51, %v2951_v1  ;;  %v625_v60 = vmul.f32 %v3634_v54, %v3011_v38  ;;  %v3633_v61 = vunpack.c.h.bf16 %v3027_v48 }
  0xe9   :  { %v636_v56 = vsel %vm279_vm0, %v624_v50, 0.0  ;;  %v1222_v59 = vsel %vm279_vm0, %v1221_v53, 0.0  ;;  %v626_v3 = vmul.f32 %v3630_v58, %v3011_v38  ;;  %v3628_v5 = vunpack.c.h.bf16 %v3037_v55 }
  0xea   :  { %310 = vadd.xlane.f32.xlu1 %v309_v26  ;;  %v1233_v63 = vsel %vm279_vm0, %v1225_v57, 0.0  ;;  %v639_v11 = vsel %vm279_vm0, %v625_v60, 0.0  ;;  %v1226_v13 = vmul.f32 %v3633_v61, %v2951_v1  ;;  %v3631_v14 = vunpack.c.l.bf16 %v3049_v62  ;;  %v3073_v26 = vld [vmem:[#allocation9 + $0x10] sm:$0xff]  }
  0xeb   :  { %307 = vadd.xlane.f32.xlu0 %v306_v28  ;;  %v642_v18 = vsel %vm279_vm0, %v626_v3, 0.0  ;;  %v627_v19 = vmul.f32 %v3628_v5, %v3011_v38  ;;  %v3626_v20 = vunpack.c.l.bf16 %v3061_v15  ;;  %v3629_v24 = vunpack.c.h.bf16 %v3049_v62 }
  0xec   :  { %v1236_v21 = vsel %vm279_vm0, %v1226_v13, 0.0  ;;  %v1227_v23 = vmul.f32 %v3631_v14, %v2951_v1  ;;  %v3624_v29 = vunpack.c.h.bf16 %v3061_v15  ;;  %v3622_v43 = vunpack.c.l.bf16 %v3085_v37 }
  0xed   :  { %v645_v27 = vsel %vm279_vm0, %v627_v19, 0.0  ;;  %v628_v28 = vmul.f32 %v3626_v20, %v3011_v38  ;;  %v1228_v34 = vmul.f32 %v3629_v24, %v2951_v1  ;;  %v3623_v53 = vunpack.c.h.bf16 %v3085_v37  ;;  %v3123_v19 = vld [vmem:[%s3603_s6 + $0x8] sm:$0xff]  }
  0xee   :  { %316 = vadd.xlane.f32.xlu1 %v315_v33  ;;  %v1239_v33 = vsel %vm279_vm0, %v1227_v23, 0.0  ;;  %v1534_v13 = vmul.f32 %v2998_v30, %v3025_v47  ;;  %v3619_v23 = vunpack.c.h.bf16 %v3123_v19 }
  0xef   :  { %313 = vadd.xlane.f32.xlu0 %v312_v36  ;;  %v3627_v36 = vunpack.c.l.bf16 %v3073_v26  ;;  %v648_v41 = vsel %vm279_vm0, %v628_v28, 0.0  ;;  %v3618_v28 = vunpack.c.l.bf16 %v3123_v19 }
  0xf1   :  { %v1229_v46 = vmul.f32 %v3627_v36, %v2951_v1 }
  0xf2   :  { %614 = vadd.xlane.f32.xlu1 %v613_v42  ;;  %v629_v42 = vmul.f32 %v3624_v29, %v3011_v38 }
  0xf3   :  { %319 = vadd.xlane.f32.xlu0 %v318_v45  ;;  %v1242_v45 = vsel %vm279_vm0, %v1228_v34, 0.0 }
  0xf4   :  { %v651_v50 = vsel %vm279_vm0, %v629_v42, 0.0 }
  0xf6   :  { %634 = vadd.xlane.f32.xlu1 %v633_v49  ;;  %v3625_v49 = vunpack.c.h.bf16 %v3073_v26 }
  0xf7   :  { %631 = vadd.xlane.f32.xlu0 %v630_v52  ;;  %v1231_v52 = vmul.f32 %v3622_v43, %v2951_v1 }
  0xf8   :  { %v1230_v57 = vmul.f32 %v3625_v49, %v2951_v1 }
  0xf9   :  { %v1251_v60 = vsel %vm279_vm0, %v1231_v52, 0.0  ;;  %v3153_v52 = vld [vmem:[%s3603_s6 + $0x18] sm:$0xff]  }
  0xfa   :  { %637 = vadd.xlane.f32.xlu1 %v636_v56  ;;  %v1245_v56 = vsel %vm279_vm0, %v1229_v46, 0.0  ;;  %v1540_v46 = vmul.f32 %v3618_v28, %v3011_v38 }
  0xfb   :  { %1223 = vadd.xlane.f32.xlu0 %v1222_v59  ;;  %v3109_v59 = vld [vmem:[%s3603_s6] sm:$0xff]  }
  0xfc   :  { %v3621_v3 = vunpack.c.h.bf16 %v3109_v59 }
  0xfe   :  { %1234 = vadd.xlane.f32.xlu1 %v1233_v63  ;;  %v1232_v63 = vmul.f32 %v3623_v53, %v2951_v1  ;;  %v1539_v1 = vmul.f32 %v3621_v3, %v3011_v38 }
  0xff   :  { %640 = vadd.xlane.f32.xlu0 %v639_v11  ;;  %v1248_v11 = vsel %vm279_vm0, %v1230_v57, 0.0 }
 0x100   :  { %v1549_v34 = vsel %vm279_vm0, %v1539_v1, 0.0 }
 0x102   :  { %643 = vadd.xlane.f32.xlu1 %v642_v18  ;;  %v3620_v18 = vunpack.c.l.bf16 %v3109_v59 }
 0x103   :  { %1237 = vadd.xlane.f32.xlu0 %v1236_v21  ;;  %v1254_v21 = vsel %vm279_vm0, %v1232_v63, 0.0  ;;  %v1552_v63 = vsel %vm279_vm0, %v1540_v46, 0.0  ;;  %v2705_v46 = vmov 1  }
 0x104   :  { %v1538_v30 = vmul.f32 %v3620_v18, %v3011_v38 }
 0x106   :  { %646 = vadd.xlane.f32.xlu1 %v645_v27  ;;  %v1535_v27 = vsel %vm279_vm0, %v1534_v13, 0.0  ;;  %v3614_v13 = vunpack.c.l.bf16 %v3153_v52 }
 0x107   :  { %1240 = vadd.xlane.f32.xlu0 %v1239_v33  ;;  %v3138_v33 = vld [vmem:[%s3603_s6 + $0x10] sm:$0xff]  }
 0x108   :  { %v3617_v42 = vunpack.c.h.bf16 %v3138_v33 }
 0x10a   :  { %649 = vadd.xlane.f32.xlu1 %v648_v41  ;;  %v1541_v41 = vmul.f32 %v3619_v23, %v3011_v38  ;;  %v1543_v57 = vmul.f32 %v3617_v42, %v3011_v38 }
 0x10b   :  { %1243 = vadd.xlane.f32.xlu0 %v1242_v45  ;;  %v1546_v45 = vsel %vm279_vm0, %v1538_v30, 0.0  ;;  %v1544_v30 = vmul.f32 %v3614_v13, %v3011_v38 }
 0x10e   :  { %652 = vadd.xlane.f32.xlu1 %v651_v50  ;;  %v3616_v50 = vunpack.c.l.bf16 %v3138_v33 }
 0x10f   :  { %1246 = vadd.xlane.f32.xlu0 %v1245_v56  ;;  %v1555_v56 = vsel %vm279_vm0, %v1541_v41, 0.0  ;;  %v1564_v41 = vsel %vm279_vm0, %v1544_v30, 0.0 }
 0x112   :  { %1252 = vadd.xlane.f32.xlu1 %v1251_v60  ;;  %v3615_v60 = vunpack.c.h.bf16 %v3153_v52 }
 0x113   :  { %1249 = vadd.xlane.f32.xlu0 %v1248_v11  ;;  %v1542_v11 = vmul.f32 %v3616_v50, %v3011_v38 }
 0x114   :  { %v1545_v1 = vmul.f32 %v3615_v60, %v3011_v38  ;;  %v2706_v38 = vmov 2  }
 0x116   :  { %1255 = vadd.xlane.f32.xlu1 %v1254_v21  ;;  %v1561_v21 = vsel %vm279_vm0, %v1543_v57, 0.0 }
 0x117   :  { %1536 = vadd.xlane.f32.xlu0 %v1535_v27  ;;  %v1558_v27 = vsel %vm279_vm0, %v1542_v11, 0.0 }
 0x11a   :  { %1550 = vadd.xlane.f32.xlu1 %v1549_v34  ;;  %v1567_v34 = vsel %vm279_vm0, %v1545_v1, 0.0 }
 0x11b   :  { %1547 = vadd.xlane.f32.xlu0 %v1546_v45  ;;  %v3178_v45 = vld [vmem:[%s3637_s26] sm:$0xff] }
 0x11e   :  { %1556 = vadd.xlane.f32.xlu1 %v1555_v56  ;;  %v220_v56 = vlaneseq }
 0x11f   :  { %1553 = vadd.xlane.f32.xlu0 %v1552_v63 }
 0x120   :  { %v3185_v57 = vshrl.u32 %v220_v56, 7 }
 0x122   :  { %1562 = vadd.xlane.f32.xlu1 %v1561_v21  ;;  %v3188_v63 = vsub.s32 1, %v3185_v57  ;;  %v3191_v11 = vsub.s32 2, %v3185_v57  ;;  %v3194_v1 = vsub.s32 0, %v3185_v57  ;;  %v3203_v28 = vsub.s32 4, %v3185_v57 }
 0x123   :  { %1559 = vadd.xlane.f32.xlu0 %v1558_v27 }
 0x126   :  { %1568 = vadd.xlane.f32.xlu1 %v1567_v34 }
 0x127   :  { %1565 = vadd.xlane.f32.xlu0 %v1564_v41  ;;  %v3199_v41 = vsub.s32 3, %v3185_v57 }
 0x137   :  { %223 = vperm.xlu1 %2381, %v3178_v45  }
 0x13b   :  { %2382 = vset.pattern.permute.xlu1 %v2705_v46 }
 0x13c   :  { %227 = vperm.xlu1 %2382, %v3178_v45  }
 0x140   :  { %2383 = vset.pattern.permute.xlu1 %v2706_v38 }
 0x141   :  { %231 = vperm.xlu1 %2383, %v3178_v45  }
 0x145   :  { %2385 = vset.pattern.permute.xlu1 %v2704_v0 }
 0x16f   :  { %v302_v21 = vpop.xlane.xlu1 %301 }
 0x170   :  { %v282_v27 = vpop.xlane.xlu0 %281 }
 0x171   :  { %v329_v30 = vrot.slane %v282_v27, %v3188_v63  ;;  %v333_v34 = vrot.slane %v282_v27, %v3191_v11  ;;  %v325_v38 = vrot.slane %v282_v27, %v3194_v1  ;;  %v337_v18 = vrot.slane %v282_v27, %v3199_v41 }
 0x173   :  { %v305_v46 = vpop.xlane.xlu1 %304  ;;  %v363_v13 = vadd.f32 %v329_v30, %v302_v21  ;;  %v341_v21 = vrot.slane %v282_v27, %v3203_v28 }
 0x174   :  { %v364_v60 = vadd.f32 %v333_v34, %v305_v46  ;;  %v299_v50 = vpop.xlane.xlu0 %298 }
 0x175   :  { %v362_v42 = vadd.f32 %v325_v38, %v299_v50  ;;  %vm371_vm1 = vcmp.ge.f32.partialorder %v363_v13, 0.0  ;;  %v379_v23 = vmul.f32 0.2, %v363_v13  ;;  %v3208_v50 = vsub.s32 5, %v3185_v57 }
 0x176   :  { %v380_v29 = vmul.f32 0.2, %v364_v60  ;;  %vm372_vm3 = vcmp.ge.f32.partialorder %v364_v60, 0.0 }
 0x177   :  { %v311_v3 = vpop.xlane.xlu1 %310  ;;  %v387_v43 = vsel %vm371_vm1, %v363_v13, %v379_v23  ;;  %vm370_vm2 = vcmp.ge.f32.partialorder %v362_v42, 0.0  ;;  %v378_v53 = vmul.f32 0.2, %v362_v42  ;;  %v3211_v23 = vsub.s32 6, %v3185_v57 }
 0x178   :  { %406 = vperm.xlu1 %2385, %v387_v43   ;;  %v308_v49 = vpop.xlane.xlu0 %307  ;;  %v366_v46 = vadd.f32 %v341_v21, %v311_v3  ;;  %v388_v20 = vsel %vm372_vm3, %v364_v60, %v380_v29  ;;  %v345_v43 = vrot.slane %v282_v27, %v3208_v50  ;;  %v3218_v29 = vsub.s32 7, %v3185_v57 }
 0x179   :  { %v365_v30 = vadd.f32 %v337_v18, %v308_v49  ;;  %v386_v34 = vsel %vm370_vm2, %v362_v42, %v378_v53  ;;  %v349_v18 = vrot.slane %v282_v27, %v3211_v23 }
 0x17a   :  { %403 = vperm.xlu0 %2384, %v386_v34   ;;  %v382_v53 = vmul.f32 0.2, %v366_v46  ;;  %vm374_vm5 = vcmp.ge.f32.partialorder %v366_v46, 0.0 }
 0x17b   :  { %v317_v38 = vpop.xlane.xlu1 %316  ;;  %v381_v36 = vmul.f32 0.2, %v365_v30  ;;  %vm373_vm4 = vcmp.ge.f32.partialorder %v365_v30, 0.0 }
 0x17c   :  { %409 = vperm.xlu1 %2385, %v388_v20   ;;  %v314_v13 = vpop.xlane.xlu0 %313  ;;  %v368_v42 = vadd.f32 %v349_v18, %v317_v38  ;;  %v390_v21 = vsel %vm374_vm5, %v366_v46, %v382_v53 }
 0x17d   :  { %v367_v5 = vadd.f32 %v345_v43, %v314_v13  ;;  %v389_v49 = vsel %vm373_vm4, %v365_v30, %v381_v36  ;;  %v353_v36 = vrot.slane %v282_v27, %v3218_v29 }
 0x17e   :  { %v384_v58 = vmul.f32 0.2, %v368_v42  ;;  %vm376_vm8 = vcmp.ge.f32.partialorder %v368_v42, 0.0 }
 0x17f   :  { %v3214_v24 = vpop.xlane.xlu1 %614  ;;  %v383_v34 = vmul.f32 0.2, %v367_v5  ;;  %vm375_vm6 = vcmp.ge.f32.partialorder %v367_v5, 0.0 }
 0x180   :  { %412 = vperm.xlu1 %2385, %v389_v49   ;;  %v320_v3 = vpop.xlane.xlu0 %319  ;;  %v658_v20 = vrot.slane %v3214_v24, %v3194_v1  ;;  %v662_v43 = vrot.slane %v3214_v24, %v3188_v63  ;;  %v666_v49 = vrot.slane %v3214_v24, %v3191_v11  ;;  %v392_v54 = vsel %vm376_vm8, %v368_v42, %v384_v58 }
 0x181   :  { %v369_v14 = vadd.f32 %v353_v36, %v320_v3  ;;  %v391_v61 = vsel %vm375_vm6, %v367_v5, %v383_v34 }
 0x183   :  { %v635_v60 = vpop.xlane.xlu1 %634  ;;  %v385_v3 = vmul.f32 0.2, %v369_v14  ;;  %vm377_vm10 = vcmp.ge.f32.partialorder %v369_v14, 0.0 }
 0x184   :  { %415 = vperm.xlu1 %2385, %v390_v21   ;;  %v632_v13 = vpop.xlane.xlu0 %631  ;;  %v696_v21 = vadd.f32 %v662_v43, %v635_v60 }
 0x185   :  { %v695_v30 = vadd.f32 %v658_v20, %v632_v13  ;;  %v393_v60 = vsel %vm377_vm10, %v369_v14, %v385_v3 }
 0x186   :  { %v712_v42 = vmul.f32 0.2, %v696_v21  ;;  %vm704_vm12 = vcmp.ge.f32.partialorder %v696_v21, 0.0 }
 0x187   :  { %v638_v51 = vpop.xlane.xlu1 %637  ;;  %vm703_vm7 = vcmp.ge.f32.partialorder %v695_v30, 0.0  ;;  %v711_v38 = vmul.f32 0.2, %v695_v30 }
 0x188   :  { %v697_v46 = vadd.f32 %v666_v49, %v638_v51  ;;  %418 = vperm.xlu1 %2385, %v391_v61   ;;  %v3227_v53 = vpop.xlane.xlu0 %1223  ;;  %v670_v51 = vrot.slane %v3214_v24, %v3199_v41  ;;  %v674_v61 = vrot.slane %v3214_v24, %v3203_v28 }
 0x189   :  { %v719_v18 = vsel %vm703_vm7, %v695_v30, %v711_v38  ;;  %v1261_v27 = vrot.slane %v3227_v53, %v3194_v1  ;;  %v1265_v58 = vrot.slane %v3227_v53, %v3188_v63 }
 0x18a   :  { %736 = vperm.xlu0 %2384, %v719_v18   ;;  %vm705_vm9 = vcmp.ge.f32.partialorder %v697_v46, 0.0  ;;  %v713_v20 = vmul.f32 0.2, %v697_v46  ;;  %v678_v18 = vrot.slane %v3214_v24, %v3208_v50 }
 0x18b   :  { %v1235_v13 = vpop.xlane.xlu1 %1234 }
 0x18c   :  { %v1298_v36 = vadd.f32 %v1261_v27, %v1235_v13  ;;  %421 = vperm.xlu1 %2385, %v392_v54   ;;  %v641_v5 = vpop.xlane.xlu0 %640  ;;  %v721_v34 = vsel %vm705_vm9, %v697_v46, %v713_v20 }
 0x18d   :  { %v698_v49 = vadd.f32 %v670_v51, %v641_v5 }
 0x18e   :  { %742 = vperm.xlu0 %2384, %v721_v34   ;;  %vm1306_vm11 = vcmp.ge.f32.partialorder %v1298_v36, 0.0  ;;  %v1314_v30 = vmul.f32 0.2, %v1298_v36  ;;  %v720_v34 = vsel %vm704_vm12, %v696_v21, %v712_v42 }
 0x18f   :  { %v644_v38 = vpop.xlane.xlu1 %643  ;;  %v714_v20 = vmul.f32 0.2, %v698_v49  ;;  %vm706_vm14 = vcmp.ge.f32.partialorder %v698_v49, 0.0 }
 0x190   :  { %v699_v54 = vadd.f32 %v674_v61, %v644_v38  ;;  %424 = vperm.xlu1 %2385, %v393_v60   ;;  %v1238_v43 = vpop.xlane.xlu0 %1237  ;;  %v1322_v46 = vsel %vm1306_vm11, %v1298_v36, %v1314_v30  ;;  %v1269_v61 = vrot.slane %v3227_v53, %v3191_v11  ;;  %v682_v36 = vrot.slane %v3214_v24, %v3211_v23 }
 0x191   :  { %v1299_v13 = vadd.f32 %v1265_v58, %v1238_v43  ;;  %v722_v58 = vsel %vm706_vm14, %v698_v49, %v714_v20 }
 0x192   :  { %1339 = vperm.xlu0 %2384, %v1322_v46   ;;  %vm707_vm13 = vcmp.ge.f32.partialorder %v699_v54, 0.0  ;;  %v715_v27 = vmul.f32 0.2, %v699_v54 }
 0x193   :  { %v647_v5 = vpop.xlane.xlu1 %646  ;;  %v1315_v38 = vmul.f32 0.2, %v1299_v13  ;;  %vm1307_vm1 = vcmp.ge.f32.partialorder %v1299_v13, 0.0 }
 0x194   :  { %v700_v14 = vadd.f32 %v678_v18, %v647_v5  ;;  %739 = vperm.xlu1 %2385, %v720_v34   ;;  %v1241_v3 = vpop.xlane.xlu0 %1240  ;;  %v723_v51 = vsel %vm707_vm13, %v699_v54, %v715_v27  ;;  %v1273_v54 = vrot.slane %v3227_v53, %v3199_v41  ;;  %v686_v18 = vrot.slane %v3214_v24, %v3218_v29 }
 0x195   :  { %v1300_v60 = vadd.f32 %v1269_v61, %v1241_v3  ;;  %v1323_v3 = vsel %vm1307_vm1, %v1299_v13, %v1315_v38 }
 0x196   :  { %748 = vperm.xlu0 %2384, %v723_v51   ;;  %vm708_vm15 = vcmp.ge.f32.partialorder %v700_v14, 0.0  ;;  %v716_v30 = vmul.f32 0.2, %v700_v14 }
 0x197   :  { %v650_v46 = vpop.xlane.xlu1 %649  ;;  %v1316_v5 = vmul.f32 0.2, %v1300_v60  ;;  %vm1308_vm3 = vcmp.ge.f32.partialorder %v1300_v60, 0.0 }
 0x198   :  { %v701_v43 = vadd.f32 %v682_v36, %v650_v46  ;;  %745 = vperm.xlu1 %2385, %v722_v58   ;;  %v1244_v21 = vpop.xlane.xlu0 %1243  ;;  %v724_v42 = vsel %vm708_vm15, %v700_v14, %v716_v30  ;;  %v1277_v14 = vrot.slane %v3227_v53, %v3203_v28  ;;  %v1285_v36 = vrot.slane %v3227_v53, %v3211_v23 }
 0x199   :  { %v1301_v34 = vadd.f32 %v1273_v54, %v1244_v21  ;;  %v1324_v21 = vsel %vm1308_vm3, %v1300_v60, %v1316_v5  ;;  %vm458_vm3 = vcmask 1041409  }
 0x19a   :  { %751 = vperm.xlu0 %2384, %v724_v42   ;;  %vm709_vm2 = vcmp.ge.f32.partialorder %v701_v43, 0.0  ;;  %v717_v27 = vmul.f32 0.2, %v701_v43 }
 0x19b   :  { %v653_v51 = vpop.xlane.xlu1 %652  ;;  %v1317_v30 = vmul.f32 0.2, %v1301_v34  ;;  %vm1309_vm5 = vcmp.ge.f32.partialorder %v1301_v34, 0.0 }
 0x19c   :  { %v702_v61 = vadd.f32 %v686_v18, %v653_v51  ;;  %1342 = vperm.xlu1 %2385, %v1323_v3   ;;  %v1247_v49 = vpop.xlane.xlu0 %1246  ;;  %v725_v20 = vsel %vm709_vm2, %v701_v43, %v717_v27  ;;  %v1281_v43 = vrot.slane %v3227_v53, %v3208_v50  ;;  %v1289_v18 = vrot.slane %v3227_v53, %v3218_v29 }
 0x19d   :  { %v1302_v46 = vadd.f32 %v1277_v14, %v1247_v49  ;;  %v1325_v49 = vsel %vm1309_vm5, %v1301_v34, %v1317_v30  ;;  %vm462_vm5 = vcmask 1043459  }
 0x19e   :  { %754 = vperm.xlu0 %2384, %v725_v20   ;;  %vm710_vm4 = vcmp.ge.f32.partialorder %v702_v61, 0.0  ;;  %v718_v24 = vmul.f32 0.2, %v702_v61 }
 0x19f   :  { %v1253_v58 = vpop.xlane.xlu1 %1252  ;;  %v1318_v27 = vmul.f32 0.2, %v1302_v46  ;;  %vm1310_vm7 = vcmp.ge.f32.partialorder %v1302_v46, 0.0 }
 0x1a0   :  { %v1304_v42 = vadd.f32 %v1285_v36, %v1253_v58  ;;  %1345 = vperm.xlu1 %2385, %v1324_v21   ;;  %v1250_v13 = vpop.xlane.xlu0 %1249  ;;  %v726_v38 = vsel %vm710_vm4, %v702_v61, %v718_v24  ;;  %vm460_vm4 = vcmask 1042434  }
 0x1a1   :  { %v1303_v51 = vadd.f32 %v1281_v43, %v1250_v13  ;;  %v1326_v53 = vsel %vm1310_vm7, %v1302_v46, %v1318_v27  ;;  %vm466_vm7 = vcmask 1045509  }
 0x1a2   :  { %v1320_v54 = vmul.f32 0.2, %v1304_v42  ;;  %757 = vperm.xlu0 %2384, %v726_v38   ;;  %vm1312_vm6 = vcmp.ge.f32.partialorder %v1304_v42, 0.0 }
 0x1a3   :  { %v1256_v3 = vpop.xlane.xlu1 %1255  ;;  %v1319_v24 = vmul.f32 0.2, %v1303_v51  ;;  %vm1311_vm9 = vcmp.ge.f32.partialorder %v1303_v51, 0.0 }
 0x1a4   :  { %v1305_v20 = vadd.f32 %v1289_v18, %v1256_v3  ;;  %1348 = vperm.xlu1 %2385, %v1325_v49   ;;  %v1537_v60 = vpop.xlane.xlu0 %1536  ;;  %v1328_v5 = vsel %vm1312_vm6, %v1304_v42, %v1320_v54  ;;  %vm464_vm6 = vcmask 1044484  }
 0x1a5   :  { %v1578_v61 = vrot.slane %v1537_v60, %v3188_v63  ;;  %v1574_v14 = vrot.slane %v1537_v60, %v3194_v1  ;;  %v1586_v34 = vrot.slane %v1537_v60, %v3199_v41  ;;  %v1582_v42 = vrot.slane %v1537_v60, %v3191_v11 }
 0x1a6   :  { %v1321_v36 = vmul.f32 0.2, %v1305_v20  ;;  %1357 = vperm.xlu0 %2384, %v1328_v5   ;;  %vm1313_vm8 = vcmp.ge.f32.partialorder %v1305_v20, 0.0  ;;  %v1327_v3 = vsel %vm1311_vm9, %v1303_v51, %v1319_v24  ;;  %v1594_v5 = vrot.slane %v1537_v60, %v3208_v50 }
 0x1a7   :  { %v1551_v58 = vpop.xlane.xlu1 %1550  ;;  %vm470_vm9 = vcmask 1047559  }
 0x1a8   :  { %v1612_v21 = vadd.f32 %v1578_v61, %v1551_v58  ;;  %1351 = vperm.xlu1 %2385, %v1326_v53   ;;  %v1548_v13 = vpop.xlane.xlu0 %1547  ;;  %v1329_v38 = vsel %vm1313_vm8, %v1305_v20, %v1321_v36  ;;  %v1590_v36 = vrot.slane %v1537_v60, %v3203_v28  ;;  %vm468_vm8 = vcmask 1046534  }
 0x1a9   :  { %v1611_v30 = vadd.f32 %v1574_v14, %v1548_v13 }
 0x1aa   :  { %v1628_v43 = vmul.f32 0.2, %v1612_v21  ;;  %1360 = vperm.xlu0 %2384, %v1329_v38   ;;  %vm1620_vm10 = vcmp.ge.f32.partialorder %v1612_v21, 0.0 }
 0x1ab   :  { %v1627_v54 = vmul.f32 0.2, %v1611_v30  ;;  %v1557_v18 = vpop.xlane.xlu1 %1556  ;;  %vm1619_vm11 = vcmp.ge.f32.partialorder %v1611_v30, 0.0 }
 0x1ac   :  { %v1614_v49 = vadd.f32 %v1586_v34, %v1557_v18  ;;  %1354 = vperm.xlu1 %2385, %v1327_v3   ;;  %v1554_v46 = vpop.xlane.xlu0 %1553  ;;  %v1636_v27 = vsel %vm1620_vm10, %v1612_v21, %v1628_v43  ;;  %v1602_v21 = vrot.slane %v1537_v60, %v3218_v29  ;;  %vm474_vm10 = vcmask 64512  }
 0x1ad   :  { %v1613_v20 = vadd.f32 %v1582_v42, %v1554_v46  ;;  %v1635_v61 = vsel %vm1619_vm11, %v1611_v30, %v1627_v54  ;;  %v1598_v54 = vrot.slane %v1537_v60, %v3211_v23 }
 0x1ae   :  { %v1630_v14 = vmul.f32 0.2, %v1614_v49  ;;  %1655 = vperm.xlu0 %2384, %v1636_v27   ;;  %vm1622_vm12 = vcmp.ge.f32.partialorder %v1614_v49, 0.0 }
 0x1af   :  { %v1629_v58 = vmul.f32 0.2, %v1613_v20  ;;  %v1563_v53 = vpop.xlane.xlu1 %1562  ;;  %vm1621_vm13 = vcmp.ge.f32.partialorder %v1613_v20, 0.0 }
 0x1b0   :  { %v1616_v13 = vadd.f32 %v1594_v5, %v1563_v53  ;;  %1652 = vperm.xlu1 %2385, %v1635_v61   ;;  %v1560_v51 = vpop.xlane.xlu0 %1559  ;;  %v1638_v34 = vsel %vm1622_vm12, %v1614_v49, %v1630_v14  ;;  %v2707_v14 = vmov 3  }
 0x1b1   :  { %v1615_v24 = vadd.f32 %v1590_v36, %v1560_v51  ;;  %v1637_v38 = vsel %vm1621_vm13, %v1613_v20, %v1629_v58 }
 0x1b2   :  { %1658 = vperm.xlu0 %2384, %v1637_v38   ;;  %v1632_v43 = vmul.f32 0.2, %v1616_v13  ;;  %vm1624_vm15 = vcmp.ge.f32.partialorder %v1616_v13, 0.0  ;;  %v3270_v38 = vand.u32 127, %v220_v56 }
 0x1b3   :  { %v1631_v42 = vmul.f32 0.2, %v1615_v24  ;;  %v1569_v30 = vpop.xlane.xlu1 %1568  ;;  %vm1623_vm14 = vcmp.ge.f32.partialorder %v1615_v24, 0.0 }
 0x1b4   :  { %v1618_v18 = vadd.f32 %v1602_v21, %v1569_v30  ;;  %1661 = vperm.xlu1 %2385, %v1638_v34   ;;  %v1566_v3 = vpop.xlane.xlu0 %1565  ;;  %v1640_v20 = vsel %vm1624_vm15, %v1616_v13, %v1632_v43  ;;  %v3274_v43 = vsub.s32 %v3270_v38, %v3185_v57  ;;  %vm2709_vm15 = vmmov 0  }
 0x1b5   :  { %v1617_v46 = vadd.f32 %v1598_v54, %v1566_v3  ;;  %v1639_v27 = vsel %vm1623_vm14, %v1615_v24, %v1631_v42 }
 0x1b6   :  { %1664 = vperm.xlu0 %2384, %v1639_v27   ;;  %v1634_v5 = vmul.f32 0.2, %v1618_v18  ;;  %vm1626_vm2 = vcmp.ge.f32.partialorder %v1618_v18, 0.0 }
 0x1b7   :  { %v1633_v61 = vmul.f32 0.2, %v1617_v46  ;;  %vm1625_vm1 = vcmp.ge.f32.partialorder %v1617_v46, 0.0  ;;  %v224_v60 = vpop.permute.xlu1 %223 }
 0x1b8   :  { %1667 = vperm.xlu1 %2385, %v1640_v20   ;;  %v1642_v36 = vsel %vm1626_vm2, %v1618_v18, %v1634_v5  ;;  %vm225_vm11 = vcmp.lt.s32.totalorder %v3270_v38, %v224_v60 }
 0x1b9   :  { %v1641_v49 = vsel %vm1625_vm1, %v1617_v46, %v1633_v61  ;;  %vm2126_vm1 = vcmask 7168  }
 0x1ba   :  { %1670 = vperm.xlu0 %2384, %v1641_v49  }
 0x1bb   :  { %v3265_v58 = vpop.permute.xlu1 %227 }
 0x1bc   :  { %1673 = vperm.xlu1 %2385, %v1642_v36   ;;  %vm229_vm12 = vcmp.lt.s32.totalorder %v3270_v38, %v3265_v58 }
 0x1be   :  { %2386 = vset.pattern.permute.xlu0 %v2707_v14 }
 0x1bf   :  { %235 = vperm.xlu0 %2386, %v3178_v45  }
 0x1c0   :  { %v3267_v53 = vpop.permute.xlu1 %231 }
 0x1c1   :  { %vm233_vm13 = vcmp.lt.s32.totalorder %v3270_v38, %v3267_v53 }
 0x1c3   :  { %2387 = vset.pattern.permute.xlu0 %v2704_v0 }
 0x1f7   :  { %v407_v51 = vpop.permute.xlu1 %406 }
 0x1f8   :  { %v433_v42 = vrot.slane %v407_v51, %v3274_v43 }
 0x1f9   :  { %v404_v34 = vpop.permute.xlu0 %403 }
 0x1fa   :  { %v429_v45 = vrot.slane %v404_v34, %v3274_v43 }
 0x1fb   :  { %v410_v13 = vpop.permute.xlu1 %409 }
 0x1fc   :  { %v437_v30 = vrot.slane %v410_v13, %v3274_v43  ;;  %v459_v18 = vsel %vm458_vm3, %v433_v42, %v429_v45 }
 0x1fe   :  { %v461_v27 = vsel %vm460_vm4, %v437_v30, %v459_v18 }
 0x1ff   :  { %v413_v24 = vpop.permute.xlu1 %412 }
 0x200   :  { %v441_v56 = vrot.slane %v413_v24, %v3274_v43 }
 0x202   :  { %v463_v20 = vsel %vm462_vm5, %v441_v56, %v461_v27 }
 0x203   :  { %v416_v21 = vpop.permute.xlu1 %415 }
 0x204   :  { %v445_v3 = vrot.slane %v416_v21, %v3274_v43 }
 0x206   :  { %v465_v49 = vsel %vm464_vm6, %v445_v3, %v463_v20 }
 0x207   :  { %v419_v0 = vpop.permute.xlu1 %418 }
 0x208   :  { %v449_v57 = vrot.slane %v419_v0, %v3274_v43 }
 0x209   :  { %v737_v54 = vpop.permute.xlu0 %736 }
 0x20a   :  { %v467_v14 = vsel %vm466_vm7, %v449_v57, %v465_v49  ;;  %v762_v18 = vrot.slane %v737_v54, %v3274_v43 }
 0x20b   :  { %v422_v46 = vpop.permute.xlu1 %421 }
 0x20c   :  { %v453_v5 = vrot.slane %v422_v46, %v3274_v43 }
 0x20d   :  { %v743_v61 = vpop.permute.xlu0 %742 }
 0x20e   :  { %v469_v24 = vsel %vm468_vm8, %v453_v5, %v467_v14  ;;  %v770_v60 = vrot.slane %v743_v61, %v3274_v43 }
 0x20f   :  { %v425_v36 = vpop.permute.xlu1 %424 }
 0x210   :  { %v457_v51 = vrot.slane %v425_v36, %v3274_v43 }
 0x211   :  { %v1340_v13 = vpop.permute.xlu0 %1339 }
 0x212   :  { %v471_v34 = vsel %vm470_vm9, %v457_v51, %v469_v24 }
 0x213   :  { %v740_v21 = vpop.permute.xlu1 %739  ;;  %v3292_v45 = vsel %vm225_vm11, %v471_v34, -1e+30 }
 0x214   :  { %v766_v0 = vrot.slane %v740_v21, %v3274_v43  ;;  %v475_v42 = vsel %vm474_vm10, %v3292_v45, -inf }
 0x215   :  { %476 = vmax.xlane.f32.xlu1 %v475_v42  ;;  %v749_v30 = vpop.permute.xlu0 %748 }
 0x216   :  { %v791_v3 = vsel %vm458_vm3, %v766_v0, %v762_v18  ;;  %v778_v49 = vrot.slane %v749_v30, %v3274_v43 }
 0x217   :  { %v746_v56 = vpop.permute.xlu1 %745  ;;  %v792_v27 = vsel %vm460_vm4, %v770_v60, %v791_v3 }
 0x218   :  { %v774_v46 = vrot.slane %v746_v56, %v3274_v43 }
 0x219   :  { %v752_v57 = vpop.permute.xlu0 %751 }
 0x21a   :  { %v793_v20 = vsel %vm462_vm5, %v774_v46, %v792_v27  ;;  %v782_v14 = vrot.slane %v752_v57, %v3274_v43  ;;  %v1365_v27 = vrot.slane %v1340_v13, %v3274_v43 }
 0x21b   :  { %v1343_v5 = vpop.permute.xlu1 %1342  ;;  %v794_v54 = vsel %vm464_vm6, %v778_v49, %v793_v20 }
 0x21c   :  { %v795_v21 = vsel %vm466_vm7, %v782_v14, %v794_v54  ;;  %v1369_v3 = vrot.slane %v1343_v5, %v3274_v43 }
 0x21d   :  { %v755_v36 = vpop.permute.xlu0 %754 }
 0x21e   :  { %v786_v51 = vrot.slane %v755_v36, %v3274_v43  ;;  %v1394_v58 = vsel %vm458_vm3, %v1369_v3, %v1365_v27 }
 0x21f   :  { %v1346_v24 = vpop.permute.xlu1 %1345 }
 0x220   :  { %v796_v42 = vsel %vm468_vm8, %v786_v51, %v795_v21  ;;  %v1373_v60 = vrot.slane %v1346_v24, %v3274_v43 }
 0x221   :  { %v758_v34 = vpop.permute.xlu0 %757 }
 0x222   :  { %v790_v61 = vrot.slane %v758_v34, %v3274_v43  ;;  %v1395_v14 = vsel %vm460_vm4, %v1373_v60, %v1394_v58 }
 0x223   :  { %v1349_v0 = vpop.permute.xlu1 %1348 }
 0x224   :  { %v797_v30 = vsel %vm470_vm9, %v790_v61, %v796_v42  ;;  %v1377_v20 = vrot.slane %v1349_v0, %v3274_v43 }
 0x225   :  { %v1358_v18 = vpop.permute.xlu0 %1357  ;;  %v799_v56 = vsel %vm229_vm12, %v797_v30, -1e+30 }
 0x226   :  { %v800_v46 = vsel %vm474_vm10, %v799_v56, -inf  ;;  %v1396_v5 = vsel %vm462_vm5, %v1377_v20, %v1395_v14  ;;  %v1389_v24 = vrot.slane %v1358_v18, %v3274_v43 }
 0x227   :  { %v1352_v57 = vpop.permute.xlu1 %1351  ;;  %801 = vmax.xlane.f32.xlu0 %v800_v46 }
 0x228   :  { %v1381_v49 = vrot.slane %v1352_v57, %v3274_v43 }
 0x229   :  { %v1361_v36 = vpop.permute.xlu0 %1360 }
 0x22a   :  { %v1397_v34 = vsel %vm464_vm6, %v1381_v49, %v1396_v5  ;;  %v1393_v13 = vrot.slane %v1361_v36, %v3274_v43 }
 0x22b   :  { %v1355_v54 = vpop.permute.xlu1 %1354 }
 0x22c   :  { %v1385_v51 = vrot.slane %v1355_v54, %v3274_v43 }
 0x22d   :  { %v1656_v21 = vpop.permute.xlu0 %1655 }
 0x22e   :  { %v1398_v61 = vsel %vm466_vm7, %v1385_v51, %v1397_v34  ;;  %v1682_v30 = vrot.slane %v1656_v21, %v3274_v43 }
 0x22f   :  { %v1653_v0 = vpop.permute.xlu1 %1652  ;;  %v1399_v42 = vsel %vm468_vm8, %v1389_v24, %v1398_v61 }
 0x230   :  { %v1678_v3 = vrot.slane %v1653_v0, %v3274_v43  ;;  %v1400_v46 = vsel %vm470_vm9, %v1393_v13, %v1399_v42 }
 0x231   :  { %v1659_v18 = vpop.permute.xlu0 %1658  ;;  %v1402_v60 = vsel %vm233_vm13, %v1400_v46, -1e+30 }
 0x232   :  { %v1707_v57 = vsel %vm458_vm3, %v1682_v30, %v1678_v3  ;;  %v1686_v27 = vrot.slane %v1659_v18, %v3274_v43  ;;  %v1403_v20 = vsel %vm474_vm10, %v1402_v60, -inf }
 0x233   :  { %v1662_v49 = vpop.permute.xlu1 %1661  ;;  %1404 = vmax.xlane.f32.xlu1 %v1403_v20 }
 0x234   :  { %v1708_v36 = vsel %vm460_vm4, %v1686_v27, %v1707_v57  ;;  %v1690_v53 = vrot.slane %v1662_v49, %v3274_v43 }
 0x235   :  { %v1665_v58 = vpop.permute.xlu0 %1664 }
 0x236   :  { %v1709_v14 = vsel %vm462_vm5, %v1690_v53, %v1708_v36  ;;  %v1694_v54 = vrot.slane %v1665_v58, %v3274_v43 }
 0x237   :  { %v1668_v5 = vpop.permute.xlu1 %1667 }
 0x238   :  { %v1710_v51 = vsel %vm464_vm6, %v1694_v54, %v1709_v14  ;;  %v1698_v24 = vrot.slane %v1668_v5, %v3274_v43 }
 0x239   :  { %v1671_v34 = vpop.permute.xlu0 %1670 }
 0x23a   :  { %v1711_v21 = vsel %vm466_vm7, %v1698_v24, %v1710_v51  ;;  %v1702_v13 = vrot.slane %v1671_v34, %v3274_v43 }
 0x23b   :  { %v1674_v61 = vpop.permute.xlu1 %1673 }
 0x23c   :  { %v1706_v0 = vrot.slane %v1674_v61, %v3274_v43  ;;  %v1712_v42 = vsel %vm468_vm8, %v1702_v13, %v1711_v21 }
 0x23e   :  { %v236_v30 = vpop.permute.xlu0 %235  ;;  %v1713_v3 = vsel %vm470_vm9, %v1706_v0, %v1712_v42 }
 0x23f   :  { %vm237_vm14 = vcmp.lt.s32.totalorder %v3270_v38, %v236_v30 }
 0x240   :  { %v1715_v46 = vsel %vm237_vm14, %v1713_v3, -1e+30 }
 0x241   :  { %v1716_v18 = vsel %vm474_vm10, %v1715_v46, -inf }
 0x242   :  { %1717 = vmax.xlane.f32.xlu0 %v1716_v18 }
 0x2a2   :  { %v477_v57 = vpop.xlane.xlu1 %476 }
 0x2a3   :  { %v478_v27 = vsub.f32 %v3292_v45, %v477_v57 }
 0x2a5   :  { %v479_v20 = vmul.f32 1.442695, %v478_v27 }
 0x2a7   :  { %2388 = vpow2.f32 %v479_v20 }
 0x2b1   :  { %v2389_v49 = vpop.eup %2388 }
 0x2b2   :  { %v481_v36 = vsel %vm474_vm10, %v2389_v49, 0.0 }
 0x2b3   :  { %482 = vadd.xlane.f32.xlu1 %v481_v36  ;;  %v210_v36 = vld [vmem:[#allocation19] sm:$0xff] }
 0x2b4   :  { %v802_v43 = vpop.xlane.xlu0 %801 }
 0x2b5   :  { %v803_v53 = vsub.f32 %v799_v56, %v802_v43  ;;  %v211_v43 = vld [vmem:[#allocation19 + $0x8] sm:$0xff] }
 0x2b7   :  { %v804_v58 = vmul.f32 1.442695, %v803_v53  ;;  %v206_v53 = vld [vmem:[#allocation18] sm:$0xff] }
 0x2b9   :  { %2390 = vpow2.f32 %v804_v58  ;;  %v2323_v58 = vpack.c.bf16 %v211_v43, %v210_v36 }
 0x2c0   :  { %v1405_v14 = vpop.xlane.xlu1 %1404 }
 0x2c1   :  { %v1406_v54 = vsub.f32 %v1402_v60, %v1405_v14  ;;  %v207_v14 = vld [vmem:[#allocation18 + $0x8] sm:$0xff] }
 0x2c3   :  { %v2391_v38 = vpop.eup %2390  ;;  %v1407_v5 = vmul.f32 1.442695, %v1406_v54  ;;  %v2708_v54 = vmov 0.0|0.0  }
 0x2c4   :  { %v806_v51 = vsel %vm474_vm10, %v2391_v38, 0.0  ;;  %2322 = vmatprep.subr.bf16.mxu0 %v2708_v54  ;;  %2328 = vmatprep.subr.bf16.mxu1 %v2708_v54 }
 0x2c5   :  { %2392 = vpow2.f32 %v1407_v5  ;;  %807 = vadd.xlane.f32.xlu0 %v806_v51  ;;  %v3368_v5 = vpack.c.bf16 %v207_v14, %v206_v53  ;;  %2324 = vmatpush3.bf16.msra.mxu0 %v2323_v58 }
 0x2c6   :  { %2325 = vmatprep.subr.bf16.mxu0 %v2708_v54 }
 0x2c7   :  { %2330 = vmatpush3.bf16.msra.mxu1 %v3368_v5 }
 0x2c8   :  { %2331 = vmatprep.subr.bf16.mxu1 %v2708_v54 }
 0x2cf   :  { %v3352_v24 = vpop.eup %2392  ;;  %v1718_v45 = vpop.xlane.xlu0 %1717 }
 0x2d0   :  { %v1719_v34 = vsub.f32 %v1715_v46, %v1718_v45  ;;  %v1409_v21 = vsel %vm474_vm10, %v3352_v24, 0.0 }
 0x2d1   :  { %1410 = vadd.xlane.f32.xlu1 %v1409_v21 }
 0x2d2   :  { %v1720_v13 = vmul.f32 1.442695, %v1719_v34 }
 0x2d4   :  { %2394 = vpow2.f32 %v1720_v13  ;;  %v212_v13 = vld [vmem:[#allocation19 + $0x10] sm:$0xff] }
 0x2de   :  { %v3356_v56 = vpop.eup %2394 }
 0x2df   :  { %v1722_v60 = vsel %vm474_vm10, %v3356_v56, 0.0 }
 0x2e0   :  { %1723 = vadd.xlane.f32.xlu0 %v1722_v60  ;;  %v213_v60 = vld [vmem:[#allocation19 + $0x18] sm:$0xff] }
 0x340   :  { %v483_v61 = vpop.xlane.xlu1 %482 }
 0x341   :  { %2396 = vrcp.f32 %v483_v61  ;;  %v2326_v61 = vpack.c.bf16 %v213_v60, %v212_v13 }
 0x343   :  { %2327 = vmatpush3.bf16.msra.mxu0 %v2326_v61 }
 0x344   :  { %2334 = vmatprep.subr.bf16.mxu0 %v2708_v54 }
 0x34b   :  { %v2397_v0 = vpop.eup %2396 }
 0x34c   :  { %v485_v42 = vmul.f32 %v2397_v0, %v2389_v49  ;;  %v208_v0 = vld [vmem:[#allocation18 + $0x10] sm:$0xff] }
 0x34e   :  { %v489_v30 = vrot.slane %v485_v42, %v3194_v1  ;;  %v496_v3 = vrot.slane %v485_v42, %v3188_v63  ;;  %v503_v18 = vrot.slane %v485_v42, %v3191_v11  ;;  %v517_v57 = vrot.slane %v485_v42, %v3203_v28 }
 0x34f   :  { %v510_v27 = vrot.slane %v485_v42, %v3199_v41  ;;  %v531_v20 = vrot.slane %v485_v42, %v3211_v23  ;;  %v524_v49 = vrot.slane %v485_v42, %v3208_v50  ;;  %v538_v21 = vrot.slane %v485_v42, %v3218_v29 }
 0x350   :  { %491 = vbcast.lane.b32.xlu1 %v489_v30, 256  ;;  %498 = vbcast.lane.b32.xlu0 %v496_v3, 256  ;;  %v209_v30 = vld [vmem:[#allocation18 + $0x18] sm:$0xff] }
 0x351   :  { %v3377_v42 = vpack.c.bf16 %v209_v30, %v208_v0 }
 0x352   :  { %v808_v46 = vpop.xlane.xlu0 %807 }
 0x353   :  { %2398 = vrcp.f32 %v808_v46  ;;  %v2710_v46 = vmov 0.0   ;;  %2333 = vmatpush3.bf16.msra.mxu1 %v3377_v42 }
 0x354   :  { %505 = vbcast.lane.b32.xlu1 %v503_v18, 256  ;;  %519 = vbcast.lane.b32.xlu0 %v517_v57, 256 }
 0x355   :  { %2264 = vmatprep.mubr.msk.f32.mxu0 %vm2709_vm15, %v2710_v46  ;;  %2275 = vmatprep.mubr.msk.f32.mxu1 %vm2709_vm15, %v2710_v46 }
 0x356   :  { %2340 = vmatprep.subr.bf16.mxu1 %v2708_v54  ;;  %2276 = vmatmul.mubr.msk.f32.vlgmr.msra.gmra.mrb[0].mxu1 %vm279_vm0, %v2961_v9 }
 0x357   :  { %2342 = vmatpush3.bf16.msra.mxu1 %v2323_v58  ;;  %2297 = vmatprep.mubr.msk.f32.mxu1 %vm2709_vm15, %v2710_v46 }
 0x358   :  { %512 = vbcast.lane.b32.xlu1 %v510_v27, 256  ;;  %533 = vbcast.lane.b32.xlu0 %v531_v20, 256 }
 0x359   :  { %2343 = vmatprep.subr.bf16.mxu1 %v2708_v54 }
 0x35b   :  { %2345 = vmatpush3.bf16.msra.mxu1 %v2326_v61 }
 0x35c   :  { %526 = vbcast.lane.b32.xlu1 %v524_v49, 256  ;;  %2352 = vmatprep.subr.bf16.mxu1 %v2708_v54 }
 0x35d   :  { %v2399_v51 = vpop.eup %2398 }
 0x35e   :  { %v810_v45 = vmul.f32 %v2399_v51, %v2391_v38  ;;  %v1411_v34 = vpop.xlane.xlu1 %1410 }
 0x35f   :  { %2400 = vrcp.f32 %v1411_v34 }
 0x360   :  { %540 = vbcast.lane.b32.xlu1 %v538_v21, 256  ;;  %v814_v3 = vrot.slane %v810_v45, %v3194_v1  ;;  %v821_v38 = vrot.slane %v810_v45, %v3188_v63  ;;  %v828_v18 = vrot.slane %v810_v45, %v3191_v11  ;;  %v835_v57 = vrot.slane %v810_v45, %v3199_v41 }
 0x361   :  { %v842_v53 = vrot.slane %v810_v45, %v3203_v28  ;;  %v856_v51 = vrot.slane %v810_v45, %v3211_v23  ;;  %v863_v21 = vrot.slane %v810_v45, %v3218_v29 }
 0x362   :  { %816 = vbcast.lane.b32.xlu0 %v814_v3, 256 }
 0x364   :  { %823 = vbcast.lane.b32.xlu1 %v821_v38, 256 }
 0x366   :  { %830 = vbcast.lane.b32.xlu0 %v828_v18, 256 }
 0x368   :  { %837 = vbcast.lane.b32.xlu1 %v835_v57, 256 }
 0x369   :  { %v2401_v27 = vpop.eup %2400 }
 0x36a   :  { %v1413_v20 = vmul.f32 %v2401_v27, %v3352_v24  ;;  %v849_v24 = vrot.slane %v810_v45, %v3208_v50 }
 0x36c   :  { %v1424_v49 = vrot.slane %v1413_v20, %v3188_v63  ;;  %v1417_v36 = vrot.slane %v1413_v20, %v3194_v1  ;;  %v1431_v43 = vrot.slane %v1413_v20, %v3191_v11  ;;  %v1438_v58 = vrot.slane %v1413_v20, %v3199_v41 }
 0x36d   :  { %v1724_v9 = vpop.xlane.xlu0 %1723  ;;  %v1445_v14 = vrot.slane %v1413_v20, %v3203_v28  ;;  %v1452_v34 = vrot.slane %v1413_v20, %v3208_v50  ;;  %v1466_v61 = vrot.slane %v1413_v20, %v3218_v29  ;;  %v1459_v0 = vrot.slane %v1413_v20, %v3211_v23 }
 0x36e   :  { %1426 = vbcast.lane.b32.xlu1 %v1424_v49, 256  ;;  %1419 = vbcast.lane.b32.xlu0 %v1417_v36, 256  ;;  %2402 = vrcp.f32 %v1724_v9 }
 0x372   :  { %1433 = vbcast.lane.b32.xlu1 %v1431_v43, 256  ;;  %844 = vbcast.lane.b32.xlu0 %v842_v53, 256 }
 0x376   :  { %1440 = vbcast.lane.b32.xlu1 %v1438_v58, 256  ;;  %851 = vbcast.lane.b32.xlu0 %v849_v24, 256 }
 0x378   :  { %v2403_v13 = vpop.eup %2402 }
 0x379   :  { %v1726_v60 = vmul.f32 %v2403_v13, %v3356_v56 }
 0x37a   :  { %1447 = vbcast.lane.b32.xlu1 %v1445_v14, 256  ;;  %858 = vbcast.lane.b32.xlu0 %v856_v51, 256 }
 0x37b   :  { %v1737_v30 = vrot.slane %v1726_v60, %v3188_v63  ;;  %v1730_v3 = vrot.slane %v1726_v60, %v3194_v1  ;;  %v1751_v38 = vrot.slane %v1726_v60, %v3199_v41  ;;  %v1744_v45 = vrot.slane %v1726_v60, %v3191_v11 }
 0x37c   :  { %v1765_v56 = vrot.slane %v1726_v60, %v3208_v50  ;;  %v1758_v18 = vrot.slane %v1726_v60, %v3203_v28  ;;  %v1779_v57 = vrot.slane %v1726_v60, %v3218_v29  ;;  %v1772_v63 = vrot.slane %v1726_v60, %v3211_v23 }
 0x37e   :  { %1454 = vbcast.lane.b32.xlu1 %v1452_v34, 256  ;;  %865 = vbcast.lane.b32.xlu0 %v863_v21, 256 }
 0x382   :  { %1468 = vbcast.lane.b32.xlu1 %v1466_v61, 256  ;;  %1461 = vbcast.lane.b32.xlu0 %v1459_v0, 256 }
 0x386   :  { %1739 = vbcast.lane.b32.xlu1 %v1737_v30, 256  ;;  %1732 = vbcast.lane.b32.xlu0 %v1730_v3, 256 }
 0x38a   :  { %1753 = vbcast.lane.b32.xlu1 %v1751_v38, 256  ;;  %1746 = vbcast.lane.b32.xlu0 %v1744_v45, 256 }
 0x38e   :  { %1767 = vbcast.lane.b32.xlu1 %v1765_v56, 256  ;;  %1760 = vbcast.lane.b32.xlu0 %v1758_v18, 256 }
 0x392   :  { %1781 = vbcast.lane.b32.xlu1 %v1779_v57, 256  ;;  %1774 = vbcast.lane.b32.xlu0 %v1772_v63, 256 }
 0x3c2   :  { %v492_v1 = vpop.permute.xlu1 %491  ;;  %v499_v27 = vpop.permute.xlu0 %498 }
 0x3c3   :  { %v542_v41 = vmul.f32 %v2152_v7, %v492_v1  ;;  %v543_v11 = vmul.f32 %v2153_v4, %v499_v27 }
 0x3c5   :  { %v550_v50 = vsel %vm279_vm0, %v542_v41, 0.0  ;;  %v557_v28 = vsel %vm279_vm0, %v543_v11, 0.0 }
 0x3c6   :  { %v551_v20 = vrot.slane %v550_v50, 4  ;;  %v558_v49 = vrot.slane %v557_v28, 4  ;;  %v506_v36 = vpop.permute.xlu1 %505  ;;  %v520_v29 = vpop.permute.xlu0 %519 }
 0x3c7   :  { %v544_v23 = vmul.f32 %v2156_v10, %v506_v36  ;;  %v546_v9 = vmul.f32 %v2160_v12, %v520_v29 }
 0x3c8   :  { %v552_v43 = vadd.f32 %v551_v20, %v550_v50  ;;  %v559_v53 = vadd.f32 %v558_v49, %v557_v28 }
 0x3c9   :  { %v564_v7 = vsel %vm279_vm0, %v544_v23, 0.0  ;;  %v578_v2 = vsel %vm279_vm0, %v546_v9, 0.0 }
 0x3ca   :  { %v553_v4 = vrot.slane %v552_v43, 2  ;;  %v560_v58 = vrot.slane %v559_v53, 2  ;;  %v565_v24 = vrot.slane %v564_v7, 4  ;;  %v579_v14 = vrot.slane %v578_v2, 4  ;;  %v513_v51 = vpop.permute.xlu1 %512  ;;  %v534_v34 = vpop.permute.xlu0 %533 }
 0x3cb   :  { %v545_v21 = vmul.f32 %v2157_v16, %v513_v51  ;;  %v548_v10 = vmul.f32 %v2164_v22, %v534_v34 }
 0x3cc   :  { %v554_v13 = vadd.f32 %v553_v4, %v552_v43  ;;  %v561_v12 = vadd.f32 %v560_v58, %v559_v53  ;;  %v566_v60 = vadd.f32 %v565_v24, %v564_v7  ;;  %v580_v61 = vadd.f32 %v579_v14, %v578_v2 }
 0x3cd   :  { %v571_v0 = vsel %vm279_vm0, %v545_v21, 0.0  ;;  %v592_v30 = vsel %vm279_vm0, %v548_v10, 0.0 }
 0x3ce   :  { %v555_v3 = vrot.slane %v554_v13, 1  ;;  %v562_v38 = vrot.slane %v561_v12, 1  ;;  %v567_v45 = vrot.slane %v566_v60, 2  ;;  %v581_v56 = vrot.slane %v580_v61, 2  ;;  %v527_v18 = vpop.permute.xlu1 %526 }
 0x3cf   :  { %v572_v57 = vrot.slane %v571_v0, 4  ;;  %v593_v63 = vrot.slane %v592_v30, 4  ;;  %v547_v6 = vmul.f32 %v2161_v25, %v527_v18 }
 0x3d0   :  { %v568_v16 = vadd.f32 %v567_v45, %v566_v60  ;;  %v582_v22 = vadd.f32 %v581_v56, %v580_v61  ;;  %v556_v11 = vadd.f32 %v555_v3, %v554_v13  ;;  %v563_v50 = vadd.f32 %v562_v38, %v561_v12 }
 0x3d1   :  { %v573_v1 = vadd.f32 %v572_v57, %v571_v0  ;;  %v594_v27 = vadd.f32 %v593_v63, %v592_v30  ;;  %v585_v41 = vsel %vm279_vm0, %v547_v6, 0.0  ;;  %v3638_v63 = vunpack.c.h.bf16 %v3014_v40 }
 0x3d2   :  { %v569_v28 = vrot.slane %v568_v16, 1  ;;  %v586_v20 = vrot.slane %v585_v41, 4  ;;  %v541_v49 = vpop.permute.xlu1 %540  ;;  %v583_v9 = vrot.slane %v582_v22, 1  ;;  %v939_v4 = vsel %vm458_vm3, %v563_v50, %v556_v11  ;;  %v214_v11 = vld [vmem:[%s3611_s14] sm:$0xff]  ;;  %v215_v50 = vld [vmem:[%s3611_s14 + $0x8] sm:$0xff] }
 0x3d3   :  { %v574_v36 = vrot.slane %v573_v1, 2  ;;  %v595_v29 = vrot.slane %v594_v27, 2  ;;  %v549_v23 = vmul.f32 %v2165_v31, %v541_v49 }
 0x3d4   :  { %v587_v43 = vadd.f32 %v586_v20, %v585_v41  ;;  %v817_v8 = vpop.permute.xlu0 %816  ;;  %v570_v25 = vadd.f32 %v569_v28, %v568_v16  ;;  %v584_v21 = vadd.f32 %v583_v9, %v582_v22 }
 0x3d5   :  { %v575_v53 = vadd.f32 %v574_v36, %v573_v1  ;;  %v599_v7 = vsel %vm279_vm0, %v549_v23, 0.0  ;;  %v867_v2 = vmul.f32 %v2168_v39, %v817_v8  ;;  %v596_v34 = vadd.f32 %v595_v29, %v594_v27 }
 0x3d6   :  { %v588_v58 = vrot.slane %v587_v43, 2  ;;  %v600_v24 = vrot.slane %v599_v7, 4  ;;  %v824_v14 = vpop.permute.xlu1 %823  ;;  %v940_v61 = vsel %vm460_vm4, %v570_v25, %v939_v4 }
 0x3d7   :  { %v576_v51 = vrot.slane %v575_v53, 1  ;;  %v875_v17 = vsel %vm279_vm0, %v867_v2, 0.0  ;;  %v868_v31 = vmul.f32 %v2169_v35, %v824_v14  ;;  %v597_v35 = vrot.slane %v596_v34, 1 }
 0x3d8   :  { %v589_v10 = vadd.f32 %v588_v58, %v587_v43  ;;  %v601_v13 = vadd.f32 %v600_v24, %v599_v7  ;;  %v876_v12 = vrot.slane %v875_v17, 4  ;;  %v831_v60 = vpop.permute.xlu0 %830  ;;  %v3463_v2 = vpack.c.bf16 %v215_v50, %v214_v11 }
 0x3d9   :  { %v577_v39 = vadd.f32 %v576_v51, %v575_v53  ;;  %v882_v0 = vsel %vm279_vm0, %v868_v31, 0.0  ;;  %v869_v30 = vmul.f32 %v2172_v44, %v831_v60  ;;  %v598_v36 = vadd.f32 %v597_v35, %v596_v34  ;;  %v217_v31 = vld [vmem:[%s3611_s14 + $0x18] sm:$0xff] }
 0x3da   :  { %v590_v3 = vrot.slane %v589_v10, 1  ;;  %v602_v38 = vrot.slane %v601_v13, 2  ;;  %v877_v45 = vadd.f32 %v876_v12, %v875_v17  ;;  %v883_v56 = vrot.slane %v882_v0, 4  ;;  %v838_v18 = vpop.permute.xlu1 %837  ;;  %v216_v17 = vld [vmem:[%s3611_s14 + $0x10] sm:$0xff] }
 0x3db   :  { %v941_v32 = vsel %vm462_vm5, %v577_v39, %v940_v61  ;;  %v889_v57 = vsel %vm279_vm0, %v869_v30, 0.0  ;;  %v870_v6 = vmul.f32 %v3638_v63, %v838_v18  ;;  %v3639_v58 = vunpack.c.h.bf16 %v3027_v48 }
 0x3dc   :  { %v591_v16 = vadd.f32 %v590_v3, %v589_v10  ;;  %v603_v22 = vadd.f32 %v602_v38, %v601_v13  ;;  %v878_v1 = vrot.slane %v877_v45, 2  ;;  %v884_v27 = vadd.f32 %v883_v56, %v882_v0 }
 0x3dd   :  { %v890_v41 = vrot.slane %v889_v57, 4  ;;  %v896_v44 = vsel %vm279_vm0, %v870_v6, 0.0  ;;  %v942_v40 = vsel %vm464_vm6, %v584_v21, %v941_v32  ;;  %v3640_v14 = vunpack.c.l.bf16 %v3027_v48 }
 0x3de   :  { %v604_v28 = vrot.slane %v603_v22, 1  ;;  %v885_v20 = vrot.slane %v884_v27, 2  ;;  %v897_v49 = vrot.slane %v896_v44, 4  ;;  %v879_v29 = vadd.f32 %v878_v1, %v877_v45 }
 0x3df   :  { %v891_v23 = vadd.f32 %v890_v41, %v889_v57  ;;  %v943_v9 = vsel %vm466_vm7, %v591_v16, %v942_v40  ;;  %v3481_v45 = vpack.c.bf16 %v217_v31, %v216_v17  ;;  %v3641_v18 = vunpack.c.l.bf16 %v3049_v62 }
 0x3e0   :  { %v605_v43 = vadd.f32 %v604_v28, %v603_v22  ;;  %v886_v8 = vadd.f32 %v885_v20, %v884_v27  ;;  %v898_v25 = vadd.f32 %v897_v49, %v896_v44  ;;  %v1427_v53 = vpop.permute.xlu1 %1426  ;;  %v1420_v7 = vpop.permute.xlu0 %1419  ;;  %v944_v34 = vsel %vm468_vm8, %v598_v36, %v943_v9 }
 0x3e1   :  { %v892_v4 = vrot.slane %v891_v23, 2  ;;  %v1471_v24 = vmul.f32 %v3639_v58, %v1427_v53  ;;  %v1470_v51 = vmul.f32 %v3640_v14, %v1420_v7  ;;  %v880_v12 = vrot.slane %v879_v29, 1 }
 0x3e2   :  { %v887_v21 = vrot.slane %v886_v8, 1  ;;  %v899_v10 = vrot.slane %v898_v25, 2  ;;  %v945_v13 = vsel %vm470_vm9, %v605_v43, %v944_v34  ;;  %v3642_v35 = vunpack.c.l.bf16 %v3037_v55 }
 0x3e3   :  { %v893_v60 = vadd.f32 %v892_v4, %v891_v23  ;;  %v1485_v61 = vsel %vm279_vm0, %v1471_v24, 0.0  ;;  %v1478_v48 = vsel %vm279_vm0, %v1470_v51, 0.0  ;;  %2265 = vmatmul.mubr.msk.f32.vlgmr.msra.gmra.mrb[0].mxu0 %vm279_vm0, %v945_v13  ;;  %v881_v22 = vadd.f32 %v880_v12, %v879_v29 }
 0x3e4   :  { %v900_v39 = vadd.f32 %v899_v10, %v898_v25  ;;  %v1486_v0 = vrot.slane %v1485_v61, 4  ;;  %v1479_v30 = vrot.slane %v1478_v48, 4  ;;  %v1434_v3 = vpop.permute.xlu1 %1433  ;;  %v845_v38 = vpop.permute.xlu0 %844  ;;  %2336 = vmatpush3.bf16.msra.mxu0 %v3463_v2  ;;  %2286 = vmatprep.mubr.msk.f32.mxu0 %vm2709_vm15, %v2710_v46  ;;  %v888_v56 = vadd.f32 %v887_v21, %v886_v8 }
 0x3e5   :  { %v1472_v32 = vmul.f32 %v3641_v18, %v1434_v3  ;;  %v871_v57 = vmul.f32 %v3642_v35, %v845_v38  ;;  %2337 = vmatprep.subr.bf16.mxu0 %v2708_v54  ;;  %v894_v63 = vrot.slane %v893_v60, 1  ;;  %v3643_v36 = vunpack.c.h.bf16 %v3049_v62 }
 0x3e6   :  { %v1487_v6 = vadd.f32 %v1486_v0, %v1485_v61  ;;  %v1480_v16 = vadd.f32 %v1479_v30, %v1478_v48  ;;  %v901_v1 = vrot.slane %v900_v39, 1  ;;  %v1099_v49 = vsel %vm458_vm3, %v888_v56, %v881_v22 }
 0x3e7   :  { %v1492_v27 = vsel %vm279_vm0, %v1472_v32, 0.0  ;;  %v903_v41 = vsel %vm279_vm0, %v871_v57, 0.0  ;;  %v3644_v29 = vunpack.c.h.bf16 %v3037_v55  ;;  %v895_v43 = vadd.f32 %v894_v63, %v893_v60 }
 0x3e8   :  { %v1488_v44 = vrot.slane %v1487_v6, 2  ;;  %v1481_v11 = vrot.slane %v1480_v16, 2  ;;  %v1493_v50 = vrot.slane %v1492_v27, 4  ;;  %v1441_v28 = vpop.permute.xlu1 %1440  ;;  %v852_v20 = vpop.permute.xlu0 %851  ;;  %2339 = vmatpush3.bf16.msra.mxu0 %v3481_v45  ;;  %v904_v40 = vrot.slane %v903_v41, 4 }
 0x3e9   :  { %v1473_v23 = vmul.f32 %v3643_v36, %v1441_v28  ;;  %v872_v9 = vmul.f32 %v3644_v29, %v852_v20  ;;  %2346 = vmatprep.subr.bf16.mxu0 %v2708_v54  ;;  %v902_v7 = vadd.f32 %v901_v1, %v900_v39  ;;  %v3645_v10 = vunpack.c.l.bf16 %v3073_v26 }
 0x3ea   :  { %v1489_v8 = vadd.f32 %v1488_v44, %v1487_v6  ;;  %v1482_v25 = vadd.f32 %v1481_v11, %v1480_v16  ;;  %v1494_v53 = vadd.f32 %v1493_v50, %v1492_v27  ;;  %v905_v4 = vadd.f32 %v904_v40, %v903_v41 }
 0x3eb   :  { %v1499_v58 = vsel %vm279_vm0, %v1473_v23, 0.0  ;;  %v910_v24 = vsel %vm279_vm0, %v872_v9, 0.0  ;;  %v3646_v12 = vunpack.c.l.bf16 %v3061_v15  ;;  %v1100_v61 = vsel %vm460_vm4, %v895_v43, %v1099_v49 }
 0x3ec   :  { %v1490_v14 = vrot.slane %v1489_v8, 1  ;;  %v1483_v51 = vrot.slane %v1482_v25, 1  ;;  %v1495_v34 = vrot.slane %v1494_v53, 2  ;;  %v1500_v62 = vrot.slane %v1499_v58, 4  ;;  %v1448_v17 = vpop.permute.xlu1 %1447  ;;  %v859_v31 = vpop.permute.xlu0 %858 }
 0x3ed   :  { %v906_v55 = vrot.slane %v905_v4, 2  ;;  %v911_v21 = vrot.slane %v910_v24, 4  ;;  %v1474_v13 = vmul.f32 %v3645_v10, %v1448_v17  ;;  %v873_v60 = vmul.f32 %v3646_v12, %v859_v31 }
 0x3ee   :  { %v1491_v48 = vadd.f32 %v1490_v14, %v1489_v8  ;;  %v1496_v39 = vadd.f32 %v1495_v34, %v1494_v53  ;;  %v1501_v0 = vadd.f32 %v1500_v62, %v1499_v58  ;;  %v1484_v18 = vadd.f32 %v1483_v51, %v1482_v25 }
 0x3ef   :  { %v907_v30 = vadd.f32 %v906_v55, %v905_v4  ;;  %v912_v3 = vadd.f32 %v911_v21, %v910_v24  ;;  %v1506_v38 = vsel %vm279_vm0, %v1474_v13, 0.0  ;;  %v917_v56 = vsel %vm279_vm0, %v873_v60, 0.0 }
 0x3f0   :  { %v1497_v32 = vrot.slane %v1496_v39, 1  ;;  %v1502_v35 = vrot.slane %v1501_v0, 2  ;;  %v1507_v57 = vrot.slane %v1506_v38, 4  ;;  %v1455_v63 = vpop.permute.xlu1 %1454  ;;  %v866_v6 = vpop.permute.xlu0 %865  ;;  %v918_v1 = vrot.slane %v917_v56, 4 }
 0x3f1   :  { %v908_v16 = vrot.slane %v907_v30, 1  ;;  %v913_v22 = vrot.slane %v912_v3, 2  ;;  %v3647_v27 = vunpack.c.h.bf16 %v3073_v26  ;;  %v3648_v28 = vunpack.c.h.bf16 %v3061_v15 }
 0x3f2   :  { %v1498_v44 = vadd.f32 %v1497_v32, %v1496_v39  ;;  %v1503_v11 = vadd.f32 %v1502_v35, %v1501_v0  ;;  %v1508_v50 = vadd.f32 %v1507_v57, %v1506_v38  ;;  %v919_v36 = vadd.f32 %v918_v1, %v917_v56 }
 0x3f3   :  { %v1475_v41 = vmul.f32 %v3647_v27, %v1455_v63  ;;  %v874_v20 = vmul.f32 %v3648_v28, %v866_v6  ;;  %v909_v49 = vadd.f32 %v908_v16, %v907_v30  ;;  %v914_v40 = vadd.f32 %v913_v22, %v912_v3 }
 0x3f4   :  { %v1855_v29 = vsel %vm458_vm3, %v1491_v48, %v1484_v18  ;;  %v1504_v9 = vrot.slane %v1503_v11, 1  ;;  %v1509_v43 = vrot.slane %v1508_v50, 2  ;;  %v1469_v25 = vpop.permute.xlu1 %1468  ;;  %v1462_v53 = vpop.permute.xlu0 %1461  ;;  %v1101_v26 = vsel %vm462_vm5, %v902_v7, %v1100_v61 }
 0x3f5   :  { %v1513_v23 = vsel %vm279_vm0, %v1475_v41, 0.0  ;;  %v1856_v4 = vsel %vm460_vm4, %v1498_v44, %v1855_v29  ;;  %v920_v58 = vrot.slane %v919_v36, 2  ;;  %v924_v15 = vsel %vm279_vm0, %v874_v20, 0.0 }
 0x3f6   :  { %v1514_v8 = vrot.slane %v1513_v23, 4  ;;  %v3518_v24 = vsel %vm464_vm6, %v909_v49, %v1101_v26  ;;  %v1510_v14 = vadd.f32 %v1509_v43, %v1508_v50  ;;  %v925_v34 = vrot.slane %v924_v15, 4 }
 0x3f7   :  { %v915_v62 = vrot.slane %v914_v40, 1  ;;  %v921_v17 = vadd.f32 %v920_v58, %v919_v36  ;;  %v3649_v31 = vunpack.c.h.bf16 %v3085_v37  ;;  %v3650_v21 = vunpack.c.l.bf16 %v3085_v37 }
 0x3f8   :  { %v1515_v51 = vadd.f32 %v1514_v8, %v1513_v23  ;;  %v1505_v7 = vadd.f32 %v1504_v9, %v1503_v11  ;;  %v1511_v13 = vrot.slane %v1510_v14, 1  ;;  %v926_v60 = vadd.f32 %v925_v34, %v924_v15  ;;  %v1740_v61 = vpop.permute.xlu1 %1739  ;;  %v1733_v48 = vpop.permute.xlu0 %1732 }
 0x3f9   :  { %v1477_v55 = vmul.f32 %v3649_v31, %v1469_v25  ;;  %v1476_v10 = vmul.f32 %v3650_v21, %v1462_v53  ;;  %v922_v39 = vrot.slane %v921_v17, 1  ;;  %v3651_v3 = vunpack.c.h.bf16 %v3109_v59 }
 0x3fa   :  { %v1516_v12 = vrot.slane %v1515_v51, 2  ;;  %v1512_v56 = vadd.f32 %v1511_v13, %v1510_v14  ;;  %v927_v32 = vrot.slane %v926_v60, 2  ;;  %v916_v37 = vadd.f32 %v915_v62, %v914_v40 }
 0x3fb   :  { %v1527_v0 = vsel %vm279_vm0, %v1477_v55, 0.0  ;;  %v1520_v30 = vsel %vm279_vm0, %v1476_v10, 0.0  ;;  %v1784_v38 = vmul.f32 %v3651_v3, %v1740_v61  ;;  %v3652_v6 = vunpack.c.l.bf16 %v3109_v59 }
 0x3fc   :  { %v1517_v18 = vadd.f32 %v1516_v12, %v1515_v51  ;;  %v1528_v35 = vrot.slane %v1527_v0, 4  ;;  %v1521_v57 = vrot.slane %v1520_v30, 4  ;;  %v1857_v22 = vsel %vm462_vm5, %v1505_v7, %v1856_v4  ;;  %v1754_v44 = vpop.permute.xlu1 %1753  ;;  %v1747_v11 = vpop.permute.xlu0 %1746 }
 0x3fd   :  { %v1798_v63 = vsel %vm279_vm0, %v1784_v38, 0.0  ;;  %v1783_v16 = vmul.f32 %v3652_v6, %v1733_v48  ;;  %v3532_v1 = vadd.f32 %v922_v39, %v921_v17  ;;  %v928_v27 = vadd.f32 %v927_v32, %v926_v60 }
 0x3fe   :  { %v1529_v41 = vadd.f32 %v1528_v35, %v1527_v0  ;;  %v1522_v50 = vadd.f32 %v1521_v57, %v1520_v30  ;;  %v1799_v28 = vrot.slane %v1798_v63, 4  ;;  %v3653_v49 = vunpack.c.h.bf16 %v3123_v19 }
 0x3ff   :  { %v1791_v20 = vsel %vm279_vm0, %v1783_v16, 0.0  ;;  %v3538_v36 = vsel %vm464_vm6, %v1512_v56, %v1857_v22  ;;  %v1518_v59 = vrot.slane %v1517_v18, 1  ;;  %v3654_v25 = vunpack.c.l.bf16 %v3123_v19 }
 0x400   :  { %v1786_v40 = vmul.f32 %v3653_v49, %v1754_v44  ;;  %v1530_v23 = vrot.slane %v1529_v41, 2  ;;  %v1792_v29 = vrot.slane %v1791_v20, 4  ;;  %v1523_v9 = vrot.slane %v1522_v50, 2  ;;  %v1768_v14 = vpop.permute.xlu1 %1767  ;;  %v1761_v51 = vpop.permute.xlu0 %1760 }
 0x401   :  { %v1800_v43 = vadd.f32 %v1799_v28, %v1798_v63  ;;  %v1785_v53 = vmul.f32 %v3654_v25, %v1747_v11  ;;  %v929_v26 = vrot.slane %v928_v27, 1  ;;  %v3655_v31 = vunpack.c.h.bf16 %v3138_v33 }
 0x402   :  { %v1812_v8 = vsel %vm279_vm0, %v1786_v40, 0.0  ;;  %v1531_v4 = vadd.f32 %v1530_v23, %v1529_v41  ;;  %v1793_v58 = vadd.f32 %v1792_v29, %v1791_v20  ;;  %v1524_v34 = vadd.f32 %v1523_v9, %v1522_v50 }
 0x403   :  { %v1813_v15 = vrot.slane %v1812_v8, 4  ;;  %v1801_v62 = vrot.slane %v1800_v43, 2  ;;  %v1805_v17 = vsel %vm279_vm0, %v1785_v53, 0.0  ;;  %v1788_v55 = vmul.f32 %v3655_v31, %v1768_v14 }
 0x404   :  { %v1532_v21 = vrot.slane %v1531_v4, 1  ;;  %v1794_v10 = vrot.slane %v1793_v58, 2  ;;  %v1806_v13 = vrot.slane %v1805_v17, 4  ;;  %v1525_v12 = vrot.slane %v1524_v34, 1  ;;  %v1782_v38 = vpop.permute.xlu1 %1781  ;;  %v1775_v41 = vpop.permute.xlu0 %1774 }
 0x405   :  { %v1814_v7 = vadd.f32 %v1813_v15, %v1812_v8  ;;  %v1802_v19 = vadd.f32 %v1801_v62, %v1800_v43  ;;  %v1826_v60 = vsel %vm279_vm0, %v1788_v55, 0.0  ;;  %v3656_v61 = vunpack.c.l.bf16 %v3138_v33 }
 0x406   :  { %v1519_v39 = vadd.f32 %v1518_v59, %v1517_v18  ;;  %v1795_v0 = vadd.f32 %v1794_v10, %v1793_v58  ;;  %v1807_v3 = vadd.f32 %v1806_v13, %v1805_v17  ;;  %v930_v56 = vadd.f32 %v929_v26, %v928_v27 }
 0x407   :  { %v1787_v48 = vmul.f32 %v3656_v61, %v1761_v51  ;;  %v1815_v30 = vrot.slane %v1814_v7, 2  ;;  %v1803_v32 = vrot.slane %v1802_v19, 1  ;;  %v1827_v35 = vrot.slane %v1826_v60, 4 }
 0x408   :  { %v1796_v63 = vrot.slane %v1795_v0, 1  ;;  %v1808_v16 = vrot.slane %v1807_v3, 2  ;;  %v1533_v44 = vadd.f32 %v1532_v21, %v1531_v4  ;;  %v1526_v11 = vadd.f32 %v1525_v12, %v1524_v34 }
 0x409   :  { %v1819_v57 = vsel %vm279_vm0, %v1787_v48, 0.0  ;;  %v1816_v6 = vadd.f32 %v1815_v30, %v1814_v7  ;;  %v1828_v50 = vadd.f32 %v1827_v35, %v1826_v60  ;;  %v3657_v33 = vunpack.c.h.bf16 %v3153_v52 }
 0x40a   :  { %v1820_v22 = vrot.slane %v1819_v57, 4  ;;  %v1804_v28 = vadd.f32 %v1803_v32, %v1802_v19  ;;  %v1809_v20 = vadd.f32 %v1808_v16, %v1807_v3  ;;  %v1103_v27 = vsel %vm466_vm7, %v916_v37, %v3518_v24 }
 0x40b   :  { %v1790_v18 = vmul.f32 %v3657_v33, %v1782_v38  ;;  %v1797_v40 = vadd.f32 %v1796_v63, %v1795_v0  ;;  %v1829_v59 = vrot.slane %v1828_v50, 2  ;;  %v3658_v29 = vunpack.c.l.bf16 %v3153_v52  ;;  %v2097_v38 = vld [vmem:[#allocation10] sm:$0xf]  ;;  %v2146_v63 = vld [vmem:[%s3612_s15] ss:$0 sm:$0xff] }
 0x40c   :  { %v1821_v49 = vadd.f32 %v1820_v22, %v1819_v57  ;;  %v1817_v43 = vrot.slane %v1816_v6, 1  ;;  %v1810_v8 = vrot.slane %v1809_v20, 1  ;;  %v1104_v53 = vsel %vm468_vm8, %v3532_v1, %v1103_v27 }
 0x40d   :  { %v1840_v23 = vsel %vm279_vm0, %v1790_v18, 0.0  ;;  %v1789_v9 = vmul.f32 %v3658_v29, %v1775_v41  ;;  %v1830_v26 = vadd.f32 %v1829_v59, %v1828_v50  ;;  %v1105_v4 = vsel %vm470_vm9, %v930_v56, %v1104_v53 }
 0x40e   :  { %v1822_v25 = vrot.slane %v1821_v49, 2  ;;  %v1841_v58 = vrot.slane %v1840_v23, 4  ;;  %v1811_v24 = vadd.f32 %v1810_v8, %v1809_v20  ;;  %2287 = vmatmul.mubr.msk.f32.vlgmr.msra.gmra.mrb[2].mxu0 %vm279_vm0, %v1105_v4  ;;  %v1859_v52 = vsel %vm466_vm7, %v1519_v39, %v3538_v36 }
 0x40f   :  { %v1833_v15 = vsel %vm279_vm0, %v1789_v9, 0.0  ;;  %2348 = vmatpush3.bf16.msra.mxu0 %v3368_v5  ;;  %v1860_v34 = vsel %vm468_vm8, %v1526_v11, %v1859_v52  ;;  %2308 = vmatprep.mubr.msk.f32.mxu0 %vm2709_vm15, %v2710_v46  ;;  %v2015_v31 = vsel %vm458_vm3, %v1804_v28, %v1797_v40  ;;  %v1818_v55 = vadd.f32 %v1817_v43, %v1816_v6 }
 0x410   :  { %v1823_v37 = vadd.f32 %v1822_v25, %v1821_v49  ;;  %v1834_v14 = vrot.slane %v1833_v15, 4  ;;  %v1842_v51 = vadd.f32 %v1841_v58, %v1840_v23  ;;  %2349 = vmatprep.subr.bf16.mxu0 %v2708_v54  ;;  %v1861_v17 = vsel %vm470_vm9, %v1533_v44, %v1860_v34 }
 0x411   :  { %v1831_v21 = vrot.slane %v1830_v26, 1  ;;  %2298 = vmatmul.mubr.msk.f32.vlgmr.msra.gmra.mrb[2].mxu1 %vm279_vm0, %v1861_v17  ;;  %v2016_v5 = vsel %vm460_vm4, %v1811_v24, %v2015_v31  ;;  %v2098_v56 = vunpack.c.l.bf16 %v2097_v38 }
 0x412   :  { %v1824_v1 = vrot.slane %v1823_v37, 1  ;;  %v1835_v62 = vadd.f32 %v1834_v14, %v1833_v15  ;;  %v1843_v10 = vrot.slane %v1842_v51, 2  ;;  %2354 = vmatpush3.bf16.msra.mxu1 %v3463_v2  ;;  %2319 = vmatprep.mubr.msk.f32.mxu1 %vm2709_vm15, %v2710_v46  ;;  %v2017_v60 = vsel %vm462_vm5, %v1818_v55, %v2016_v5 }
 0x413   :  { %2351 = vmatpush3.bf16.msra.mxu0 %v3377_v42  ;;  %2355 = vmatprep.subr.bf16.mxu1 %v2708_v54  ;;  %v1832_v19 = vadd.f32 %v1831_v21, %v1830_v26  ;;  %v2106_v32 = vmul.f32 %v2098_v56, %v2098_v56 }
 0x414   :  { %v1825_v36 = vadd.f32 %v1824_v1, %v1823_v37  ;;  %v1836_v7 = vrot.slane %v1835_v62, 2  ;;  %v1844_v13 = vadd.f32 %v1843_v10, %v1842_v51 }
 0x415   :  { %v2107_v35 = vsel %vm279_vm0, %v2106_v32, 0.0 }
 0x416   :  { %v1837_v12 = vadd.f32 %v1836_v7, %v1835_v62  ;;  %v1845_v61 = vrot.slane %v1844_v13, 1  ;;  %v2018_v48 = vsel %vm464_vm6, %v1825_v36, %v2017_v60  ;;  %2309 = vmatmul.mubr.msk.f32.vlgmr.msra.gmra.mrb[4].mxu0 %vm279_vm0, %v3025_v47  ;;  %2357 = vmatpush3.bf16.msra.mxu1 %v3481_v45 }
 0x417   :  { %v2019_v0 = vsel %vm466_vm7, %v1832_v19, %v2018_v48  ;;  %2108 = vadd.xlane.f32.xlu1 %v2107_v35 }
 0x418   :  { %v1838_v39 = vrot.slane %v1837_v12, 1  ;;  %v1846_v2 = vadd.f32 %v1845_v61, %v1844_v13 }
 0x41a   :  { %v1839_v46 = vadd.f32 %v1838_v39, %v1837_v12 }
 0x41c   :  { %v2020_v42 = vsel %vm468_vm8, %v1839_v46, %v2019_v0 }
 0x41d   :  { %v2021_v54 = vsel %vm470_vm9, %v1846_v2, %v2020_v42 }
 0x41e   :  { %2320 = vmatmul.mubr.msk.f32.vlgmr.msra.gmra.mrb[4].mxu1 %vm279_vm0, %v2021_v54 }
 0x429   :  { %v1087_v30 = vpop.f32.mrb[0].mxu1 }
 0x42a   :  { %v2277_v3 = vpop.f32.mrb[1].mxu1 }
 0x4a4   :  { %v2109_v8 = vpop.xlane.xlu1 %2108 }
 0x4a5   :  { %v2110_v53 = vmax.f32 %v2109_v8, 1e-24 }
 0x4a7   :  { %2404 = vrsqrt.f32 %v2110_v53 }
 0x4b1   :  { %v2405_v15 = vpop.eup %2404 }
 0x4b2   :  { %v2112_v14 = vmul.f32 %v2405_v15, %v2098_v56 }
 0x4b6   :  { %v1014_v47 = vpop.f32.mrb[0].mxu0 }
 0x4b7   :  { %v1088_v45 = vadd.f32 %v1087_v30, %v1014_v47  ;;  %v2266_v57 = vpop.f32.mrb[1].mxu0 }
 0x4e1   :  { %v1174_v6 = vpop.f32.mrb[2].mxu0 }
 0x4e2   :  { %v1178_v16 = vadd.f32 %v1174_v6, %v1088_v45  ;;  %v2288_v22 = vpop.f32.mrb[3].mxu0 }
 0x4e4   :  { %v1185_v41 = vadd.f32 %v2146_v63, %v1178_v16  ;;  %v1930_v44 = vpop.f32.mrb[2].mxu1 }
 0x4e5   :  { %v2299_v11 = vpop.f32.mrb[3].mxu1 }
 0x4e6   :  { %v1186_v50 = vmax.f32 %v1185_v41, 0.0 }
 0x4e8   :  { %v2099_v33 = vmul.f32 %v1186_v50, %v1186_v50 }
 0x4e9   :  { %v2003_v18 = vpop.f32.mrb[4].mxu0 }
 0x4ea   :  { %v2004_v28 = vadd.f32 %v2003_v18, %v1930_v44  ;;  %v2100_v20 = vsel %vm279_vm0, %v2099_v33, 0.0  ;;  %v2310_v49 = vpop.f32.mrb[5].mxu0 }
 0x4eb   :  { %2101 = vadd.xlane.f32.xlu0 %v2100_v20 }
 0x4f1   :  { %v2090_v27 = vpop.f32.mrb[4].mxu1 }
 0x4f2   :  { %v2094_v40 = vadd.f32 %v2090_v27, %v2004_v28  ;;  %v2321_v59 = vpop.f32.mrb[5].mxu1 }
 0x4f4   :  { %v2095_v23 = vadd.f32 %v2146_v63, %v2094_v40 }
 0x4f6   :  { %v2096_v29 = vmax.f32 %v2095_v23, 0.0 }
 0x4f8   :  { %v2114_v9 = vmul.f32 %v2096_v29, %v2096_v29 }
 0x4fa   :  { %v2115_v43 = vsel %vm279_vm0, %v2114_v9, 0.0 }
 0x4fb   :  { %2116 = vadd.xlane.f32.xlu0 %v2115_v43 }
 0x578   :  { %v2102_v25 = vpop.xlane.xlu0 %2101 }
 0x579   :  { %v2103_v26 = vmax.f32 %v2102_v25, 1e-24 }
 0x57b   :  { %2406 = vrsqrt.f32 %v2103_v26 }
 0x585   :  { %v2407_v24 = vpop.eup %2406 }
 0x586   :  { %v2105_v37 = vmul.f32 %v2407_v24, %v1186_v50 }
 0x588   :  { %v2117_v4 = vpop.xlane.xlu0 %2116  ;;  %v2113_v51 = vadd.f32 %v2112_v14, %v2105_v37 }
 0x589   :  { %v2118_v58 = vmax.f32 %v2117_v4, 1e-24 }
 0x58b   :  { %2408 = vrsqrt.f32 %v2118_v58 }
 0x595   :  { %v2409_v52 = vpop.eup %2408 }
 0x596   :  { %v2120_v34 = vmul.f32 %v2409_v52, %v2096_v29 }
 0x598   :  { %v2121_v1 = vsub.f32 %v2113_v51, %v2120_v34 }
 0x59a   :  { %v2122_v62 = vand.u32 2147483647, %v2121_v1 }
 0x59c   :  { %v2123_v17 = vsel %vm279_vm0, %v2122_v62, 0.0 }
 0x59d   :  { %2124 = vadd.xlane.f32.xlu0 %v2123_v17 }
 0x62a   :  { %v2125_v31 = vpop.xlane.xlu0 %2124 }
 0x62b   :  { %2127 = vst.msk [vmem:[%s3659_s19] sm:$0xff] %vm2126_vm1, %v2125_v31 }
 0x62c   :  { %2132 = vsyncpa [#allocation3], 1 }
 0x62d   :  { %2133 = vsyncpa [#allocation5], 1 }
 0x62e   :  { %2134 = vsyncpa [#allocation8], 1 }
 0x62f   :  { %2135 = vsyncpa [#allocation11], 1 }
 0x630   :  { %2136 = vsyncpa [#allocation14], 1 }
 0x631   :  { %2137 = vsyncpa [#allocation17], 1 }
 0x632   :  { %2138 = vsyncpa [#allocation20], 1 }

</bundles_post_ra>
